<compile_context>
chip_gen: v5e
topology: v5e:2x2
jax: 0.10.0
libtpu: 0.0.40
codegen_flags: <defaults>
</compile_context>

<pallas_src>
import math

import jax
import jax.numpy as jnp
from jax import lax
from jax.experimental import pallas as pl
from jax.experimental.pallas import tpu as pltpu

# ---- model hyperparameters (from the PyTorch module) ----
E = 100              # embedding_dim / d_model
FF = 512             # feed_forward_dim
H = 2                # num_heads
DH = E // H          # 50, per-head dim
R = 128              # rnn_units
V = 50               # synthetic small vocab (real vocab comes from the text)
LN_EPS = 1e-5

# ---- padded (lane-aligned) sizes used inside the kernel ----
EP = 128             # E padded to a full 128-lane width
DP = 128             # per-head dim padded to a full 128-lane width
VP = 128             # vocab padded (embedding-table rows and logit lanes)
QOFF, KOFF, VOFF = 0, H * DP, 2 * H * DP

# ---- problem sizes ----
B = 2                # batch (= attention "sequence" length L)
S = 8                # seq len (= attention "batch" N, RNN time axis)
BS = B * S


def _layernorm(x, gamma, beta, mask, inv_n):
    # mean / var over the *true* width E (padded lanes of x are zero; the mask keeps
    # them out of the variance and zero-padded gamma/beta keep the output pad at 0).
    mu = jnp.sum(x, axis=-1, keepdims=True) * inv_n
    xc = (x - mu) * mask
    var = jnp.sum(xc * xc, axis=-1, keepdims=True) * inv_n
    return xc * lax.rsqrt(var + LN_EPS) * gamma + beta


def transformer_rnn_kernel(
    src_ref,                 # (BS, 1) int32 token ids
    emb_ref,                 # (VP, EP) f32 embedding table (zero padded)
    wqkv_ref, bqkv_ref,      # (EP, 3*H*DP) bf16, (1, 3*H*DP) f32  (per-head lane-aligned)
    wo_ref, bo_ref,          # (H*DP, EP) bf16, (1, EP) f32
    ln1w_ref, ln1b_ref,      # (1, EP) f32
    w1_ref, b1_ref,          # (EP, FF) bf16, (1, FF) f32
    w2_ref, b2_ref,          # (FF, EP) bf16, (1, EP) f32
    ln2w_ref, ln2b_ref,      # (1, EP) f32
    wih_ref, bih_ref,        # (EP, R) bf16, (1, R) f32
    whh_ref, bhh_ref,        # (R, R) bf16, (1, R) f32
    wfc_ref, bfc_ref,        # (R, VP) bf16, (1, VP) f32
    out_ref,                 # (B, VP) f32 logits (lane-dense; sliced to V outside)
):
    f32, bf16 = jnp.float32, jnp.bfloat16

    # ---- embedding lookup fused as a one-hot matmul ----
    ids = src_ref[...]                                               # (BS, 1) i32
    vocab_iota = lax.broadcasted_iota(jnp.int32, (BS, VP), 1)
    onehot = (vocab_iota == ids).astype(f32)                         # (BS, VP)
    x = jnp.dot(onehot, emb_ref[...], preferred_element_type=f32)    # (BS, EP), pad = 0

    lane_mask = (lax.broadcasted_iota(jnp.int32, (1, EP), 1) < E).astype(f32)
    inv_e = 1.0 / E

    # ---- multi-head self-attention over the L(=B) axis, batched over S ----
    qkv = jnp.dot(x.astype(bf16), wqkv_ref[...],
                  preferred_element_type=f32) + bqkv_ref[...]        # (BS, 3*H*DP)
    scale = 1.0 / math.sqrt(DH)
    ctx_heads = []
    for h in range(H):
        q = qkv[:, QOFF + h * DP:QOFF + (h + 1) * DP]                # 128-lane aligned
        k = qkv[:, KOFF + h * DP:KOFF + (h + 1) * DP]
        v = qkv[:, VOFF + h * DP:VOFF + (h + 1) * DP]
        q0, q1 = q[:S], q[S:]
        k0, k1 = k[:S], k[S:]
        v0, v1 = v[:S], v[S:]
        s00 = jnp.sum(q0 * k0, axis=-1, keepdims=True) * scale
        s01 = jnp.sum(q0 * k1, axis=-1, keepdims=True) * scale
        s10 = jnp.sum(q1 * k0, axis=-1, keepdims=True) * scale
        s11 = jnp.sum(q1 * k1, axis=-1, keepdims=True) * scale
        # 2-way softmax closed form: p_self = 1 / (1 + exp(s_other - s_self))
        p0 = pl.reciprocal(1.0 + jnp.exp(s01 - s00), approx=True)
        p1 = pl.reciprocal(1.0 + jnp.exp(s11 - s10), approx=True)
        ctx0 = p0 * v0 + (1.0 - p0) * v1
        ctx1 = p1 * v0 + (1.0 - p1) * v1
        ctx_heads.append(jnp.concatenate([ctx0, ctx1], axis=0))      # (BS, DP)
    ctx = jnp.concatenate(ctx_heads, axis=1)                         # (BS, H*DP)
    attn_out = jnp.dot(ctx.astype(bf16), wo_ref[...],
                       preferred_element_type=f32) + bo_ref[...]     # (BS, EP)

    # ---- residual + post-LN, feed-forward + residual + post-LN ----
    x1 = _layernorm(x + attn_out, ln1w_ref[...], ln1b_ref[...], lane_mask, inv_e)
    hff = jnp.maximum(jnp.dot(x1.astype(bf16), w1_ref[...],
                              preferred_element_type=f32) + b1_ref[...], 0.0)
    ff = jnp.dot(hff.astype(bf16), w2_ref[...],
                 preferred_element_type=f32) + b2_ref[...]
    x2 = _layernorm(x1 + ff, ln2w_ref[...], ln2b_ref[...], lane_mask, inv_e)   # (BS, EP)

    # ---- vanilla tanh RNN, batched over B; only h @ whh stays on the serial chain ----
    xih = jnp.dot(x2.astype(bf16), wih_ref[...],
                  preferred_element_type=f32) + bih_ref[...]         # (BS, R), hoisted
    whh = whh_ref[...]
    bhh = bhh_ref[...]
    batch_iota = lax.broadcasted_iota(jnp.int32, (B, 1), 0)
    sel = [(batch_iota == l).astype(f32) for l in range(B)]          # (B,1) row selectors
    h_t = jnp.zeros((B, R), f32)
    for t in range(S):
        # gather this time step's rows {l*S + t} into a (B, R) block (off the h-chain)
        x_t = sel[0] * xih[t:t + 1, :]
        for l in range(1, B):
            x_t = x_t + sel[l] * xih[l * S + t:l * S + t + 1, :]
        h_t = jnp.tanh(x_t + bhh +
                       jnp.dot(h_t.astype(bf16), whh, preferred_element_type=f32))

    out_ref[...] = jnp.dot(h_t.astype(bf16), wfc_ref[...],
                           preferred_element_type=f32) + bfc_ref[...]   # (B, VP)


# -------------------- wrapper: weight re-layout / padding --------------------

def _pad2(a, rows, cols):
    out = jnp.zeros((rows, cols), jnp.float32)
    return out.at[:a.shape[0], :a.shape[1]].set(a.astype(jnp.float32))


def _pad_row(b, n):
    out = jnp.zeros((1, n), jnp.float32)
    return out.at[0, :b.shape[0]].set(b.astype(jnp.float32))


def _prepare_args(src, p):
    bf16 = jnp.bfloat16

    # per-head, 128-lane-aligned QKV in-projection weight / bias
    wqkv = jnp.zeros((EP, 3 * H * DP), jnp.float32)
    bqkv = jnp.zeros((1, 3 * H * DP), jnp.float32)
    for which in range(3):                                   # 0=q, 1=k, 2=v
        w_blk = p["wqkv"][which * E:(which + 1) * E]         # (E, E), rows = out features
        b_blk = p["bqkv"][which * E:(which + 1) * E]
        for h in range(H):
            col = which * H * DP + h * DP
            wqkv = wqkv.at[:E, col:col + DH].set(w_blk[h * DH:(h + 1) * DH, :].T)
            bqkv = bqkv.at[0, col:col + DH].set(b_blk[h * DH:(h + 1) * DH])

    # out-projection re-laid-out to match the per-head padded ctx layout
    wo = jnp.zeros((H * DP, EP), jnp.float32)
    for h in range(H):
        wo = wo.at[h * DP:h * DP + DH, :E].set(p["wo"][:, h * DH:(h + 1) * DH].T)

    return (
        src.reshape(BS, 1).astype(jnp.int32),
        _pad2(p["emb_table"], VP, EP),                       # table kept in f32
        wqkv.astype(bf16), bqkv,
        wo.astype(bf16), _pad_row(p["bo"], EP),
        _pad_row(p["ln1w"], EP), _pad_row(p["ln1b"], EP),
        _pad2(p["w1"].T, EP, FF).astype(bf16), p["b1"][None, :].astype(jnp.float32),
        _pad2(p["w2"].T, FF, EP).astype(bf16), _pad_row(p["b2"], EP),
        _pad_row(p["ln2w"], EP), _pad_row(p["ln2b"], EP),
        _pad2(p["wih"].T, EP, R).astype(bf16), p["bih"][None, :].astype(jnp.float32),
        p["whh"].T.astype(bf16), p["bhh"][None, :].astype(jnp.float32),
        _pad2(p["wfc"].T, R, VP).astype(bf16), _pad_row(p["bfc"], VP),
    )


def transformer_rnn_forward(src, params):
    args = _prepare_args(src, params)
    vmem = pl.BlockSpec(memory_space=pltpu.MemorySpace.VMEM)
    out_pad = pl.pallas_call(
        transformer_rnn_kernel,
        out_shape=jax.ShapeDtypeStruct((B, VP), jnp.float32),
        in_specs=[vmem] * len(args),
        out_specs=vmem,
    )(*args)
    return out_pad[:, :V]


# -------------------- pure-jnp reference (PyTorch eval-mode forward) --------------------

def reference_forward(src, p):
    x = p["emb_table"][src]                                  # (B, S, E) = (L, N, E)
    L, N, _ = x.shape
    xf = x.reshape(L * N, E)
    qkv = xf @ p["wqkv"].T + p["bqkv"]
    q = qkv[:, :E].reshape(L, N, H, DH)
    k = qkv[:, E:2 * E].reshape(L, N, H, DH)
    v = qkv[:, 2 * E:].reshape(L, N, H, DH)
    scores = jnp.einsum("lnhd,mnhd->nhlm", q, k) / math.sqrt(DH)
    attn = jax.nn.softmax(scores, axis=-1)
    ctx = jnp.einsum("nhlm,mnhd->lnhd", attn, v).reshape(L * N, E)
    attn_out = ctx @ p["wo"].T + p["bo"]

    def ln(y, w, b):
        mu = y.mean(-1, keepdims=True)
        var = ((y - mu) ** 2).mean(-1, keepdims=True)
        return (y - mu) / jnp.sqrt(var + LN_EPS) * w + b

    x1 = ln(xf + attn_out, p["ln1w"], p["ln1b"])
    ff = jnp.maximum(x1 @ p["w1"].T + p["b1"], 0.0) @ p["w2"].T + p["b2"]
    x2 = ln(x1 + ff, p["ln2w"], p["ln2b"]).reshape(L, N, E)  # (B, S, E)

    h = jnp.zeros((L, R), jnp.float32)
    for t in range(N):
        h = jnp.tanh(x2[:, t, :] @ p["wih"].T + p["bih"] + h @ p["whh"].T + p["bhh"])
    return h @ p["wfc"].T + p["bfc"]


if __name__ == "__main__":
    key = jax.random.PRNGKey(0)
    ks = jax.random.split(key, 20)

    def nrm(k, shape, scale=0.05):
        return scale * jax.random.normal(k, shape, dtype=jnp.float32)

    params = {
        "emb_table": nrm(ks[0], (V, E), 0.1),
        "wqkv": nrm(ks[1], (3 * E, E)),
        "bqkv": nrm(ks[2], (3 * E,)),
        "wo": nrm(ks[3], (E, E)),
        "bo": nrm(ks[4], (E,)),
        "ln1w": jnp.ones((E,), jnp.float32),
        "ln1b": jnp.zeros((E,), jnp.float32),
        "w1": nrm(ks[5], (FF, E)),
        "b1": nrm(ks[6], (FF,)),
        "w2": nrm(ks[7], (E, FF)),
        "b2": nrm(ks[8], (E,)),
        "ln2w": jnp.ones((E,), jnp.float32),
        "ln2b": jnp.zeros((E,), jnp.float32),
        "wih": nrm(ks[9], (R, E)),
        "bih": nrm(ks[10], (R,)),
        "whh": nrm(ks[11], (R, R)),
        "bhh": nrm(ks[12], (R,)),
        "wfc": nrm(ks[13], (V, R)),
        "bfc": nrm(ks[14], (V,)),
    }
    src = jax.random.randint(ks[15], (B, S), 0, V, dtype=jnp.int32)

    out = transformer_rnn_forward(src, params)
    out = jax.block_until_ready(out)
    assert out.shape == (B, V)

    ref = reference_forward(src, params)
    import numpy as np
    # bf16 MXU operands + approx reciprocal in-kernel -> relaxed tolerance vs f32 ref
    # (still tight enough to catch any structural/semantic bug).
    np.testing.assert_allclose(np.asarray(out), np.asarray(ref), rtol=5e-2, atol=1e-2)

    print("KERNEL_OK")
</pallas_src>

<mosaic_0001>
module attributes {stable_mosaic.version = 11 : i64} {
  func.func @transformer_rnn_kernel(%arg0: memref<16x1xi32, #tpu.memory_space<vmem>>, %arg1: memref<128x128xf32, #tpu.memory_space<vmem>>, %arg2: memref<128x768xbf16, #tpu.memory_space<vmem>>, %arg3: memref<1x768xf32, #tpu.memory_space<vmem>>, %arg4: memref<256x128xbf16, #tpu.memory_space<vmem>>, %arg5: memref<1x128xf32, #tpu.memory_space<vmem>>, %arg6: memref<1x128xf32, #tpu.memory_space<vmem>>, %arg7: memref<1x128xf32, #tpu.memory_space<vmem>>, %arg8: memref<128x512xbf16, #tpu.memory_space<vmem>>, %arg9: memref<1x512xf32, #tpu.memory_space<vmem>>, %arg10: memref<512x128xbf16, #tpu.memory_space<vmem>>, %arg11: memref<1x128xf32, #tpu.memory_space<vmem>>, %arg12: memref<1x128xf32, #tpu.memory_space<vmem>>, %arg13: memref<1x128xf32, #tpu.memory_space<vmem>>, %arg14: memref<128x128xbf16, #tpu.memory_space<vmem>>, %arg15: memref<1x128xf32, #tpu.memory_space<vmem>>, %arg16: memref<128x128xbf16, #tpu.memory_space<vmem>>, %arg17: memref<1x128xf32, #tpu.memory_space<vmem>>, %arg18: memref<128x128xbf16, #tpu.memory_space<vmem>>, %arg19: memref<1x128xf32, #tpu.memory_space<vmem>>, %arg20: memref<2x128xf32, #tpu.memory_space<vmem>>) attributes {dimension_semantics = [], scalar_prefetch = 0 : i64, scratch_operands = 0 : i64, tpu.core_type = #tpu.core_type<tc>} {
    %c0 = arith.constant 0 : index
    %c0_0 = arith.constant 0 : index
    %0 = vector.load %arg0[%c0, %c0_0] : memref<16x1xi32, #tpu.memory_space<vmem>>, vector<16x1xi32>
    %1 = tpu.iota {dimensions = array<i32: 1>} : vector<16x128xi32>
    %2 = vector.broadcast %0 : vector<16x1xi32> to vector<16x128xi32>
    %3 = arith.cmpi eq, %1, %2 : vector<16x128xi32>
    %4 = arith.extui %3 : vector<16x128xi1> to vector<16x128xi32>
    %5 = arith.sitofp %4 : vector<16x128xi32> to vector<16x128xf32>
    %c0_1 = arith.constant 0 : index
    %c0_2 = arith.constant 0 : index
    %6 = vector.load %arg1[%c0_1, %c0_2] : memref<128x128xf32, #tpu.memory_space<vmem>>, vector<128x128xf32>
    %cst = arith.constant dense<0.000000e+00> : vector<16x128xf32>
    %7 = tpu.matmul %5, %6, %cst {dimension_numbers = #tpu.dot_dimension_numbers<[1], [0], [0], [1], [0, 0, 1, 1], [], []>} : vector<16x128xf32>, vector<128x128xf32>, vector<16x128xf32> -> vector<16x128xf32>
    %8 = tpu.iota {dimensions = array<i32: 1>} : vector<1x128xi32>
    %c100_i32 = arith.constant 100 : i32
    %9 = vector.broadcast %c100_i32 : i32 to vector<1x128xi32>
    %10 = arith.cmpi slt, %8, %9 : vector<1x128xi32>
    %11 = arith.extui %10 : vector<1x128xi1> to vector<1x128xi32>
    %12 = arith.sitofp %11 : vector<1x128xi32> to vector<1x128xf32>
    %13 = arith.truncf %7 : vector<16x128xf32> to vector<16x128xbf16>
    %c0_3 = arith.constant 0 : index
    %c0_4 = arith.constant 0 : index
    %14 = vector.load %arg2[%c0_3, %c0_4] : memref<128x768xbf16, #tpu.memory_space<vmem>>, vector<128x768xbf16>
    %cst_5 = arith.constant dense<0.000000e+00> : vector<16x768xf32>
    %15 = tpu.matmul %13, %14, %cst_5 {dimension_numbers = #tpu.dot_dimension_numbers<[1], [0], [0], [1], [0, 0, 1, 1], [], []>} : vector<16x128xbf16>, vector<128x768xbf16>, vector<16x768xf32> -> vector<16x768xf32>
    %c0_6 = arith.constant 0 : index
    %c0_7 = arith.constant 0 : index
    %16 = vector.load %arg3[%c0_6, %c0_7] : memref<1x768xf32, #tpu.memory_space<vmem>>, vector<1x768xf32>
    %17 = vector.broadcast %16 : vector<1x768xf32> to vector<16x768xf32>
    %18 = arith.addf %15, %17 : vector<16x768xf32>
    %19 = vector.extract_strided_slice %18 {offsets = [0, 0], sizes = [16, 128], strides = [1, 1]} : vector<16x768xf32> to vector<16x128xf32>
    %20 = vector.extract_strided_slice %18 {offsets = [0, 256], sizes = [16, 128], strides = [1, 1]} : vector<16x768xf32> to vector<16x128xf32>
    %21 = vector.extract_strided_slice %18 {offsets = [0, 512], sizes = [16, 128], strides = [1, 1]} : vector<16x768xf32> to vector<16x128xf32>
    %22 = vector.extract_strided_slice %19 {offsets = [0, 0], sizes = [8, 128], strides = [1, 1]} : vector<16x128xf32> to vector<8x128xf32>
    %23 = vector.extract_strided_slice %19 {offsets = [8, 0], sizes = [8, 128], strides = [1, 1]} : vector<16x128xf32> to vector<8x128xf32>
    %24 = vector.extract_strided_slice %20 {offsets = [0, 0], sizes = [8, 128], strides = [1, 1]} : vector<16x128xf32> to vector<8x128xf32>
    %25 = vector.extract_strided_slice %20 {offsets = [8, 0], sizes = [8, 128], strides = [1, 1]} : vector<16x128xf32> to vector<8x128xf32>
    %26 = vector.extract_strided_slice %21 {offsets = [0, 0], sizes = [8, 128], strides = [1, 1]} : vector<16x128xf32> to vector<8x128xf32>
    %27 = vector.extract_strided_slice %21 {offsets = [8, 0], sizes = [8, 128], strides = [1, 1]} : vector<16x128xf32> to vector<8x128xf32>
    %28 = arith.mulf %22, %24 : vector<8x128xf32>
    %cst_8 = arith.constant dense<0.000000e+00> : vector<8xf32>
    %29 = vector.multi_reduction <add>, %28, %cst_8 [1] : vector<8x128xf32> to vector<8xf32>
    %30 = vector.shape_cast %29 : vector<8xf32> to vector<8x1xf32>
    %cst_9 = arith.constant 0.141421363 : f32
    %31 = vector.broadcast %cst_9 : f32 to vector<8x1xf32>
    %32 = arith.mulf %30, %31 : vector<8x1xf32>
    %33 = arith.mulf %22, %25 : vector<8x128xf32>
    %cst_10 = arith.constant dense<0.000000e+00> : vector<8xf32>
    %34 = vector.multi_reduction <add>, %33, %cst_10 [1] : vector<8x128xf32> to vector<8xf32>
    %35 = vector.shape_cast %34 : vector<8xf32> to vector<8x1xf32>
    %cst_11 = arith.constant 0.141421363 : f32
    %36 = vector.broadcast %cst_11 : f32 to vector<8x1xf32>
    %37 = arith.mulf %35, %36 : vector<8x1xf32>
    %38 = arith.mulf %23, %24 : vector<8x128xf32>
    %cst_12 = arith.constant dense<0.000000e+00> : vector<8xf32>
    %39 = vector.multi_reduction <add>, %38, %cst_12 [1] : vector<8x128xf32> to vector<8xf32>
    %40 = vector.shape_cast %39 : vector<8xf32> to vector<8x1xf32>
    %cst_13 = arith.constant 0.141421363 : f32
    %41 = vector.broadcast %cst_13 : f32 to vector<8x1xf32>
    %42 = arith.mulf %40, %41 : vector<8x1xf32>
    %43 = arith.mulf %23, %25 : vector<8x128xf32>
    %cst_14 = arith.constant dense<0.000000e+00> : vector<8xf32>
    %44 = vector.multi_reduction <add>, %43, %cst_14 [1] : vector<8x128xf32> to vector<8xf32>
    %45 = vector.shape_cast %44 : vector<8xf32> to vector<8x1xf32>
    %cst_15 = arith.constant 0.141421363 : f32
    %46 = vector.broadcast %cst_15 : f32 to vector<8x1xf32>
    %47 = arith.mulf %45, %46 : vector<8x1xf32>
    %48 = arith.subf %37, %32 : vector<8x1xf32>
    %49 = math.exp %48 : vector<8x1xf32>
    %cst_16 = arith.constant 1.000000e+00 : f32
    %50 = vector.broadcast %cst_16 : f32 to vector<8x1xf32>
    %51 = arith.addf %50, %49 : vector<8x1xf32>
    %52 = tpu.reciprocal %51 {approx = true} : vector<8x1xf32> -> vector<8x1xf32>
    %53 = arith.subf %47, %42 : vector<8x1xf32>
    %54 = math.exp %53 : vector<8x1xf32>
    %cst_17 = arith.constant 1.000000e+00 : f32
    %55 = vector.broadcast %cst_17 : f32 to vector<8x1xf32>
    %56 = arith.addf %55, %54 : vector<8x1xf32>
    %57 = tpu.reciprocal %56 {approx = true} : vector<8x1xf32> -> vector<8x1xf32>
    %58 = vector.broadcast %52 : vector<8x1xf32> to vector<8x128xf32>
    %59 = arith.mulf %58, %26 : vector<8x128xf32>
    %cst_18 = arith.constant 1.000000e+00 : f32
    %60 = vector.broadcast %cst_18 : f32 to vector<8x1xf32>
    %61 = arith.subf %60, %52 : vector<8x1xf32>
    %62 = vector.broadcast %61 : vector<8x1xf32> to vector<8x128xf32>
    %63 = arith.mulf %62, %27 : vector<8x128xf32>
    %64 = arith.addf %59, %63 : vector<8x128xf32>
    %65 = vector.broadcast %57 : vector<8x1xf32> to vector<8x128xf32>
    %66 = arith.mulf %65, %26 : vector<8x128xf32>
    %cst_19 = arith.constant 1.000000e+00 : f32
    %67 = vector.broadcast %cst_19 : f32 to vector<8x1xf32>
    %68 = arith.subf %67, %57 : vector<8x1xf32>
    %69 = vector.broadcast %68 : vector<8x1xf32> to vector<8x128xf32>
    %70 = arith.mulf %69, %27 : vector<8x128xf32>
    %71 = arith.addf %66, %70 : vector<8x128xf32>
    %72 = tpu.concatenate %64, %71 in 0 : vector<8x128xf32>, vector<8x128xf32> -> vector<16x128xf32>
    %73 = vector.extract_strided_slice %18 {offsets = [0, 128], sizes = [16, 128], strides = [1, 1]} : vector<16x768xf32> to vector<16x128xf32>
    %74 = vector.extract_strided_slice %18 {offsets = [0, 384], sizes = [16, 128], strides = [1, 1]} : vector<16x768xf32> to vector<16x128xf32>
    %75 = vector.extract_strided_slice %18 {offsets = [0, 640], sizes = [16, 128], strides = [1, 1]} : vector<16x768xf32> to vector<16x128xf32>
    %76 = vector.extract_strided_slice %73 {offsets = [0, 0], sizes = [8, 128], strides = [1, 1]} : vector<16x128xf32> to vector<8x128xf32>
    %77 = vector.extract_strided_slice %73 {offsets = [8, 0], sizes = [8, 128], strides = [1, 1]} : vector<16x128xf32> to vector<8x128xf32>
    %78 = vector.extract_strided_slice %74 {offsets = [0, 0], sizes = [8, 128], strides = [1, 1]} : vector<16x128xf32> to vector<8x128xf32>
    %79 = vector.extract_strided_slice %74 {offsets = [8, 0], sizes = [8, 128], strides = [1, 1]} : vector<16x128xf32> to vector<8x128xf32>
    %80 = vector.extract_strided_slice %75 {offsets = [0, 0], sizes = [8, 128], strides = [1, 1]} : vector<16x128xf32> to vector<8x128xf32>
    %81 = vector.extract_strided_slice %75 {offsets = [8, 0], sizes = [8, 128], strides = [1, 1]} : vector<16x128xf32> to vector<8x128xf32>
    %82 = arith.mulf %76, %78 : vector<8x128xf32>
    %cst_20 = arith.constant dense<0.000000e+00> : vector<8xf32>
    %83 = vector.multi_reduction <add>, %82, %cst_20 [1] : vector<8x128xf32> to vector<8xf32>
    %84 = vector.shape_cast %83 : vector<8xf32> to vector<8x1xf32>
    %cst_21 = arith.constant 0.141421363 : f32
    %85 = vector.broadcast %cst_21 : f32 to vector<8x1xf32>
    %86 = arith.mulf %84, %85 : vector<8x1xf32>
    %87 = arith.mulf %76, %79 : vector<8x128xf32>
    %cst_22 = arith.constant dense<0.000000e+00> : vector<8xf32>
    %88 = vector.multi_reduction <add>, %87, %cst_22 [1] : vector<8x128xf32> to vector<8xf32>
    %89 = vector.shape_cast %88 : vector<8xf32> to vector<8x1xf32>
    %cst_23 = arith.constant 0.141421363 : f32
    %90 = vector.broadcast %cst_23 : f32 to vector<8x1xf32>
    %91 = arith.mulf %89, %90 : vector<8x1xf32>
    %92 = arith.mulf %77, %78 : vector<8x128xf32>
    %cst_24 = arith.constant dense<0.000000e+00> : vector<8xf32>
    %93 = vector.multi_reduction <add>, %92, %cst_24 [1] : vector<8x128xf32> to vector<8xf32>
    %94 = vector.shape_cast %93 : vector<8xf32> to vector<8x1xf32>
    %cst_25 = arith.constant 0.141421363 : f32
    %95 = vector.broadcast %cst_25 : f32 to vector<8x1xf32>
    %96 = arith.mulf %94, %95 : vector<8x1xf32>
    %97 = arith.mulf %77, %79 : vector<8x128xf32>
    %cst_26 = arith.constant dense<0.000000e+00> : vector<8xf32>
    %98 = vector.multi_reduction <add>, %97, %cst_26 [1] : vector<8x128xf32> to vector<8xf32>
    %99 = vector.shape_cast %98 : vector<8xf32> to vector<8x1xf32>
    %cst_27 = arith.constant 0.141421363 : f32
    %100 = vector.broadcast %cst_27 : f32 to vector<8x1xf32>
    %101 = arith.mulf %99, %100 : vector<8x1xf32>
    %102 = arith.subf %91, %86 : vector<8x1xf32>
    %103 = math.exp %102 : vector<8x1xf32>
    %cst_28 = arith.constant 1.000000e+00 : f32
    %104 = vector.broadcast %cst_28 : f32 to vector<8x1xf32>
    %105 = arith.addf %104, %103 : vector<8x1xf32>
    %106 = tpu.reciprocal %105 {approx = true} : vector<8x1xf32> -> vector<8x1xf32>
    %107 = arith.subf %101, %96 : vector<8x1xf32>
    %108 = math.exp %107 : vector<8x1xf32>
    %cst_29 = arith.constant 1.000000e+00 : f32
    %109 = vector.broadcast %cst_29 : f32 to vector<8x1xf32>
    %110 = arith.addf %109, %108 : vector<8x1xf32>
    %111 = tpu.reciprocal %110 {approx = true} : vector<8x1xf32> -> vector<8x1xf32>
    %112 = vector.broadcast %106 : vector<8x1xf32> to vector<8x128xf32>
    %113 = arith.mulf %112, %80 : vector<8x128xf32>
    %cst_30 = arith.constant 1.000000e+00 : f32
    %114 = vector.broadcast %cst_30 : f32 to vector<8x1xf32>
    %115 = arith.subf %114, %106 : vector<8x1xf32>
    %116 = vector.broadcast %115 : vector<8x1xf32> to vector<8x128xf32>
    %117 = arith.mulf %116, %81 : vector<8x128xf32>
    %118 = arith.addf %113, %117 : vector<8x128xf32>
    %119 = vector.broadcast %111 : vector<8x1xf32> to vector<8x128xf32>
    %120 = arith.mulf %119, %80 : vector<8x128xf32>
    %cst_31 = arith.constant 1.000000e+00 : f32
    %121 = vector.broadcast %cst_31 : f32 to vector<8x1xf32>
    %122 = arith.subf %121, %111 : vector<8x1xf32>
    %123 = vector.broadcast %122 : vector<8x1xf32> to vector<8x128xf32>
    %124 = arith.mulf %123, %81 : vector<8x128xf32>
    %125 = arith.addf %120, %124 : vector<8x128xf32>
    %126 = tpu.concatenate %118, %125 in 0 : vector<8x128xf32>, vector<8x128xf32> -> vector<16x128xf32>
    %127 = tpu.concatenate %72, %126 in 1 : vector<16x128xf32>, vector<16x128xf32> -> vector<16x256xf32>
    %128 = arith.truncf %127 : vector<16x256xf32> to vector<16x256xbf16>
    %c0_32 = arith.constant 0 : index
    %c0_33 = arith.constant 0 : index
    %129 = vector.load %arg4[%c0_32, %c0_33] : memref<256x128xbf16, #tpu.memory_space<vmem>>, vector<256x128xbf16>
    %cst_34 = arith.constant dense<0.000000e+00> : vector<16x128xf32>
    %130 = tpu.matmul %128, %129, %cst_34 {dimension_numbers = #tpu.dot_dimension_numbers<[1], [0], [0], [1], [0, 0, 1, 1], [], []>} : vector<16x256xbf16>, vector<256x128xbf16>, vector<16x128xf32> -> vector<16x128xf32>
    %c0_35 = arith.constant 0 : index
    %c0_36 = arith.constant 0 : index
    %131 = vector.load %arg5[%c0_35, %c0_36] : memref<1x128xf32, #tpu.memory_space<vmem>>, vector<1x128xf32>
    %132 = vector.broadcast %131 : vector<1x128xf32> to vector<16x128xf32>
    %133 = arith.addf %130, %132 : vector<16x128xf32>
    %134 = arith.addf %7, %133 : vector<16x128xf32>
    %c0_37 = arith.constant 0 : index
    %c0_38 = arith.constant 0 : index
    %135 = vector.load %arg6[%c0_37, %c0_38] : memref<1x128xf32, #tpu.memory_space<vmem>>, vector<1x128xf32>
    %c0_39 = arith.constant 0 : index
    %c0_40 = arith.constant 0 : index
    %136 = vector.load %arg7[%c0_39, %c0_40] : memref<1x128xf32, #tpu.memory_space<vmem>>, vector<1x128xf32>
    %cst_41 = arith.constant dense<0.000000e+00> : vector<16xf32>
    %137 = vector.multi_reduction <add>, %134, %cst_41 [1] : vector<16x128xf32> to vector<16xf32>
    %138 = vector.shape_cast %137 : vector<16xf32> to vector<16x1xf32>
    %cst_42 = arith.constant 0.00999999977 : f32
    %139 = vector.broadcast %cst_42 : f32 to vector<16x1xf32>
    %140 = arith.mulf %138, %139 : vector<16x1xf32>
    %141 = vector.broadcast %140 : vector<16x1xf32> to vector<16x128xf32>
    %142 = arith.subf %134, %141 : vector<16x128xf32>
    %143 = vector.broadcast %12 : vector<1x128xf32> to vector<16x128xf32>
    %144 = arith.mulf %142, %143 : vector<16x128xf32>
    %145 = arith.mulf %144, %144 : vector<16x128xf32>
    %cst_43 = arith.constant dense<0.000000e+00> : vector<16xf32>
    %146 = vector.multi_reduction <add>, %145, %cst_43 [1] : vector<16x128xf32> to vector<16xf32>
    %147 = vector.shape_cast %146 : vector<16xf32> to vector<16x1xf32>
    %cst_44 = arith.constant 0.00999999977 : f32
    %148 = vector.broadcast %cst_44 : f32 to vector<16x1xf32>
    %149 = arith.mulf %147, %148 : vector<16x1xf32>
    %cst_45 = arith.constant 9.99999974E-6 : f32
    %150 = vector.broadcast %cst_45 : f32 to vector<16x1xf32>
    %151 = arith.addf %149, %150 : vector<16x1xf32>
    %152 = math.rsqrt %151 : vector<16x1xf32>
    %153 = vector.broadcast %152 : vector<16x1xf32> to vector<16x128xf32>
    %154 = arith.mulf %144, %153 : vector<16x128xf32>
    %155 = vector.broadcast %135 : vector<1x128xf32> to vector<16x128xf32>
    %156 = arith.mulf %154, %155 : vector<16x128xf32>
    %157 = vector.broadcast %136 : vector<1x128xf32> to vector<16x128xf32>
    %158 = arith.addf %156, %157 : vector<16x128xf32>
    %159 = arith.truncf %158 : vector<16x128xf32> to vector<16x128xbf16>
    %c0_46 = arith.constant 0 : index
    %c0_47 = arith.constant 0 : index
    %160 = vector.load %arg8[%c0_46, %c0_47] : memref<128x512xbf16, #tpu.memory_space<vmem>>, vector<128x512xbf16>
    %cst_48 = arith.constant dense<0.000000e+00> : vector<16x512xf32>
    %161 = tpu.matmul %159, %160, %cst_48 {dimension_numbers = #tpu.dot_dimension_numbers<[1], [0], [0], [1], [0, 0, 1, 1], [], []>} : vector<16x128xbf16>, vector<128x512xbf16>, vector<16x512xf32> -> vector<16x512xf32>
    %c0_49 = arith.constant 0 : index
    %c0_50 = arith.constant 0 : index
    %162 = vector.load %arg9[%c0_49, %c0_50] : memref<1x512xf32, #tpu.memory_space<vmem>>, vector<1x512xf32>
    %163 = vector.broadcast %162 : vector<1x512xf32> to vector<16x512xf32>
    %164 = arith.addf %161, %163 : vector<16x512xf32>
    %cst_51 = arith.constant 0.000000e+00 : f32
    %165 = vector.broadcast %cst_51 : f32 to vector<16x512xf32>
    %166 = arith.maximumf %164, %165 : vector<16x512xf32>
    %167 = arith.truncf %166 : vector<16x512xf32> to vector<16x512xbf16>
    %c0_52 = arith.constant 0 : index
    %c0_53 = arith.constant 0 : index
    %168 = vector.load %arg10[%c0_52, %c0_53] : memref<512x128xbf16, #tpu.memory_space<vmem>>, vector<512x128xbf16>
    %cst_54 = arith.constant dense<0.000000e+00> : vector<16x128xf32>
    %169 = tpu.matmul %167, %168, %cst_54 {dimension_numbers = #tpu.dot_dimension_numbers<[1], [0], [0], [1], [0, 0, 1, 1], [], []>} : vector<16x512xbf16>, vector<512x128xbf16>, vector<16x128xf32> -> vector<16x128xf32>
    %c0_55 = arith.constant 0 : index
    %c0_56 = arith.constant 0 : index
    %170 = vector.load %arg11[%c0_55, %c0_56] : memref<1x128xf32, #tpu.memory_space<vmem>>, vector<1x128xf32>
    %171 = vector.broadcast %170 : vector<1x128xf32> to vector<16x128xf32>
    %172 = arith.addf %169, %171 : vector<16x128xf32>
    %173 = arith.addf %158, %172 : vector<16x128xf32>
    %c0_57 = arith.constant 0 : index
    %c0_58 = arith.constant 0 : index
    %174 = vector.load %arg12[%c0_57, %c0_58] : memref<1x128xf32, #tpu.memory_space<vmem>>, vector<1x128xf32>
    %c0_59 = arith.constant 0 : index
    %c0_60 = arith.constant 0 : index
    %175 = vector.load %arg13[%c0_59, %c0_60] : memref<1x128xf32, #tpu.memory_space<vmem>>, vector<1x128xf32>
    %cst_61 = arith.constant dense<0.000000e+00> : vector<16xf32>
    %176 = vector.multi_reduction <add>, %173, %cst_61 [1] : vector<16x128xf32> to vector<16xf32>
    %177 = vector.shape_cast %176 : vector<16xf32> to vector<16x1xf32>
    %cst_62 = arith.constant 0.00999999977 : f32
    %178 = vector.broadcast %cst_62 : f32 to vector<16x1xf32>
    %179 = arith.mulf %177, %178 : vector<16x1xf32>
    %180 = vector.broadcast %179 : vector<16x1xf32> to vector<16x128xf32>
    %181 = arith.subf %173, %180 : vector<16x128xf32>
    %182 = vector.broadcast %12 : vector<1x128xf32> to vector<16x128xf32>
    %183 = arith.mulf %181, %182 : vector<16x128xf32>
    %184 = arith.mulf %183, %183 : vector<16x128xf32>
    %cst_63 = arith.constant dense<0.000000e+00> : vector<16xf32>
    %185 = vector.multi_reduction <add>, %184, %cst_63 [1] : vector<16x128xf32> to vector<16xf32>
    %186 = vector.shape_cast %185 : vector<16xf32> to vector<16x1xf32>
    %cst_64 = arith.constant 0.00999999977 : f32
    %187 = vector.broadcast %cst_64 : f32 to vector<16x1xf32>
    %188 = arith.mulf %186, %187 : vector<16x1xf32>
    %cst_65 = arith.constant 9.99999974E-6 : f32
    %189 = vector.broadcast %cst_65 : f32 to vector<16x1xf32>
    %190 = arith.addf %188, %189 : vector<16x1xf32>
    %191 = math.rsqrt %190 : vector<16x1xf32>
    %192 = vector.broadcast %191 : vector<16x1xf32> to vector<16x128xf32>
    %193 = arith.mulf %183, %192 : vector<16x128xf32>
    %194 = vector.broadcast %174 : vector<1x128xf32> to vector<16x128xf32>
    %195 = arith.mulf %193, %194 : vector<16x128xf32>
    %196 = vector.broadcast %175 : vector<1x128xf32> to vector<16x128xf32>
    %197 = arith.addf %195, %196 : vector<16x128xf32>
    %198 = arith.truncf %197 : vector<16x128xf32> to vector<16x128xbf16>
    %c0_66 = arith.constant 0 : index
    %c0_67 = arith.constant 0 : index
    %199 = vector.load %arg14[%c0_66, %c0_67] : memref<128x128xbf16, #tpu.memory_space<vmem>>, vector<128x128xbf16>
    %cst_68 = arith.constant dense<0.000000e+00> : vector<16x128xf32>
    %200 = tpu.matmul %198, %199, %cst_68 {dimension_numbers = #tpu.dot_dimension_numbers<[1], [0], [0], [1], [0, 0, 1, 1], [], []>} : vector<16x128xbf16>, vector<128x128xbf16>, vector<16x128xf32> -> vector<16x128xf32>
    %c0_69 = arith.constant 0 : index
    %c0_70 = arith.constant 0 : index
    %201 = vector.load %arg15[%c0_69, %c0_70] : memref<1x128xf32, #tpu.memory_space<vmem>>, vector<1x128xf32>
    %202 = vector.broadcast %201 : vector<1x128xf32> to vector<16x128xf32>
    %203 = arith.addf %200, %202 : vector<16x128xf32>
    %c0_71 = arith.constant 0 : index
    %c0_72 = arith.constant 0 : index
    %204 = vector.load %arg16[%c0_71, %c0_72] : memref<128x128xbf16, #tpu.memory_space<vmem>>, vector<128x128xbf16>
    %c0_73 = arith.constant 0 : index
    %c0_74 = arith.constant 0 : index
    %205 = vector.load %arg17[%c0_73, %c0_74] : memref<1x128xf32, #tpu.memory_space<vmem>>, vector<1x128xf32>
    %206 = tpu.iota {dimensions = array<i32: 0>} : vector<2x1xi32>
    %c0_i32 = arith.constant 0 : i32
    %207 = vector.broadcast %c0_i32 : i32 to vector<2x1xi32>
    %208 = arith.cmpi eq, %206, %207 : vector<2x1xi32>
    %209 = arith.extui %208 : vector<2x1xi1> to vector<2x1xi32>
    %210 = arith.sitofp %209 : vector<2x1xi32> to vector<2x1xf32>
    %c1_i32 = arith.constant 1 : i32
    %211 = vector.broadcast %c1_i32 : i32 to vector<2x1xi32>
    %212 = arith.cmpi eq, %206, %211 : vector<2x1xi32>
    %213 = arith.extui %212 : vector<2x1xi1> to vector<2x1xi32>
    %214 = arith.sitofp %213 : vector<2x1xi32> to vector<2x1xf32>
    %cst_75 = arith.constant 0.000000e+00 : f32
    %215 = vector.broadcast %cst_75 : f32 to vector<2x128xf32>
    %216 = vector.extract_strided_slice %203 {offsets = [0, 0], sizes = [1, 128], strides = [1, 1]} : vector<16x128xf32> to vector<1x128xf32>
    %217 = vector.broadcast %210 : vector<2x1xf32> to vector<2x128xf32>
    %218 = vector.broadcast %216 : vector<1x128xf32> to vector<2x128xf32>
    %219 = arith.mulf %217, %218 : vector<2x128xf32>
    %220 = vector.extract_strided_slice %203 {offsets = [8, 0], sizes = [1, 128], strides = [1, 1]} : vector<16x128xf32> to vector<1x128xf32>
    %221 = vector.broadcast %214 : vector<2x1xf32> to vector<2x128xf32>
    %222 = vector.broadcast %220 : vector<1x128xf32> to vector<2x128xf32>
    %223 = arith.mulf %221, %222 : vector<2x128xf32>
    %224 = arith.addf %219, %223 : vector<2x128xf32>
    %225 = vector.broadcast %205 : vector<1x128xf32> to vector<2x128xf32>
    %226 = arith.addf %224, %225 : vector<2x128xf32>
    %227 = arith.truncf %215 : vector<2x128xf32> to vector<2x128xbf16>
    %cst_76 = arith.constant dense<0.000000e+00> : vector<2x128xf32>
    %228 = tpu.matmul %227, %204, %cst_76 {dimension_numbers = #tpu.dot_dimension_numbers<[1], [0], [0], [1], [0, 0, 1, 1], [], []>} : vector<2x128xbf16>, vector<128x128xbf16>, vector<2x128xf32> -> vector<2x128xf32>
    %229 = arith.addf %226, %228 : vector<2x128xf32>
    %230 = math.tanh %229 : vector<2x128xf32>
    %231 = vector.extract_strided_slice %203 {offsets = [1, 0], sizes = [1, 128], strides = [1, 1]} : vector<16x128xf32> to vector<1x128xf32>
    %232 = vector.broadcast %210 : vector<2x1xf32> to vector<2x128xf32>
    %233 = vector.broadcast %231 : vector<1x128xf32> to vector<2x128xf32>
    %234 = arith.mulf %232, %233 : vector<2x128xf32>
    %235 = vector.extract_strided_slice %203 {offsets = [9, 0], sizes = [1, 128], strides = [1, 1]} : vector<16x128xf32> to vector<1x128xf32>
    %236 = vector.broadcast %214 : vector<2x1xf32> to vector<2x128xf32>
    %237 = vector.broadcast %235 : vector<1x128xf32> to vector<2x128xf32>
    %238 = arith.mulf %236, %237 : vector<2x128xf32>
    %239 = arith.addf %234, %238 : vector<2x128xf32>
    %240 = vector.broadcast %205 : vector<1x128xf32> to vector<2x128xf32>
    %241 = arith.addf %239, %240 : vector<2x128xf32>
    %242 = arith.truncf %230 : vector<2x128xf32> to vector<2x128xbf16>
    %cst_77 = arith.constant dense<0.000000e+00> : vector<2x128xf32>
    %243 = tpu.matmul %242, %204, %cst_77 {dimension_numbers = #tpu.dot_dimension_numbers<[1], [0], [0], [1], [0, 0, 1, 1], [], []>} : vector<2x128xbf16>, vector<128x128xbf16>, vector<2x128xf32> -> vector<2x128xf32>
    %244 = arith.addf %241, %243 : vector<2x128xf32>
    %245 = math.tanh %244 : vector<2x128xf32>
    %246 = vector.extract_strided_slice %203 {offsets = [2, 0], sizes = [1, 128], strides = [1, 1]} : vector<16x128xf32> to vector<1x128xf32>
    %247 = vector.broadcast %210 : vector<2x1xf32> to vector<2x128xf32>
    %248 = vector.broadcast %246 : vector<1x128xf32> to vector<2x128xf32>
    %249 = arith.mulf %247, %248 : vector<2x128xf32>
    %250 = vector.extract_strided_slice %203 {offsets = [10, 0], sizes = [1, 128], strides = [1, 1]} : vector<16x128xf32> to vector<1x128xf32>
    %251 = vector.broadcast %214 : vector<2x1xf32> to vector<2x128xf32>
    %252 = vector.broadcast %250 : vector<1x128xf32> to vector<2x128xf32>
    %253 = arith.mulf %251, %252 : vector<2x128xf32>
    %254 = arith.addf %249, %253 : vector<2x128xf32>
    %255 = vector.broadcast %205 : vector<1x128xf32> to vector<2x128xf32>
    %256 = arith.addf %254, %255 : vector<2x128xf32>
    %257 = arith.truncf %245 : vector<2x128xf32> to vector<2x128xbf16>
    %cst_78 = arith.constant dense<0.000000e+00> : vector<2x128xf32>
    %258 = tpu.matmul %257, %204, %cst_78 {dimension_numbers = #tpu.dot_dimension_numbers<[1], [0], [0], [1], [0, 0, 1, 1], [], []>} : vector<2x128xbf16>, vector<128x128xbf16>, vector<2x128xf32> -> vector<2x128xf32>
    %259 = arith.addf %256, %258 : vector<2x128xf32>
    %260 = math.tanh %259 : vector<2x128xf32>
    %261 = vector.extract_strided_slice %203 {offsets = [3, 0], sizes = [1, 128], strides = [1, 1]} : vector<16x128xf32> to vector<1x128xf32>
    %262 = vector.broadcast %210 : vector<2x1xf32> to vector<2x128xf32>
    %263 = vector.broadcast %261 : vector<1x128xf32> to vector<2x128xf32>
    %264 = arith.mulf %262, %263 : vector<2x128xf32>
    %265 = vector.extract_strided_slice %203 {offsets = [11, 0], sizes = [1, 128], strides = [1, 1]} : vector<16x128xf32> to vector<1x128xf32>
    %266 = vector.broadcast %214 : vector<2x1xf32> to vector<2x128xf32>
    %267 = vector.broadcast %265 : vector<1x128xf32> to vector<2x128xf32>
    %268 = arith.mulf %266, %267 : vector<2x128xf32>
    %269 = arith.addf %264, %268 : vector<2x128xf32>
    %270 = vector.broadcast %205 : vector<1x128xf32> to vector<2x128xf32>
    %271 = arith.addf %269, %270 : vector<2x128xf32>
    %272 = arith.truncf %260 : vector<2x128xf32> to vector<2x128xbf16>
    %cst_79 = arith.constant dense<0.000000e+00> : vector<2x128xf32>
    %273 = tpu.matmul %272, %204, %cst_79 {dimension_numbers = #tpu.dot_dimension_numbers<[1], [0], [0], [1], [0, 0, 1, 1], [], []>} : vector<2x128xbf16>, vector<128x128xbf16>, vector<2x128xf32> -> vector<2x128xf32>
    %274 = arith.addf %271, %273 : vector<2x128xf32>
    %275 = math.tanh %274 : vector<2x128xf32>
    %276 = vector.extract_strided_slice %203 {offsets = [4, 0], sizes = [1, 128], strides = [1, 1]} : vector<16x128xf32> to vector<1x128xf32>
    %277 = vector.broadcast %210 : vector<2x1xf32> to vector<2x128xf32>
    %278 = vector.broadcast %276 : vector<1x128xf32> to vector<2x128xf32>
    %279 = arith.mulf %277, %278 : vector<2x128xf32>
    %280 = vector.extract_strided_slice %203 {offsets = [12, 0], sizes = [1, 128], strides = [1, 1]} : vector<16x128xf32> to vector<1x128xf32>
    %281 = vector.broadcast %214 : vector<2x1xf32> to vector<2x128xf32>
    %282 = vector.broadcast %280 : vector<1x128xf32> to vector<2x128xf32>
    %283 = arith.mulf %281, %282 : vector<2x128xf32>
    %284 = arith.addf %279, %283 : vector<2x128xf32>
    %285 = vector.broadcast %205 : vector<1x128xf32> to vector<2x128xf32>
    %286 = arith.addf %284, %285 : vector<2x128xf32>
    %287 = arith.truncf %275 : vector<2x128xf32> to vector<2x128xbf16>
    %cst_80 = arith.constant dense<0.000000e+00> : vector<2x128xf32>
    %288 = tpu.matmul %287, %204, %cst_80 {dimension_numbers = #tpu.dot_dimension_numbers<[1], [0], [0], [1], [0, 0, 1, 1], [], []>} : vector<2x128xbf16>, vector<128x128xbf16>, vector<2x128xf32> -> vector<2x128xf32>
    %289 = arith.addf %286, %288 : vector<2x128xf32>
    %290 = math.tanh %289 : vector<2x128xf32>
    %291 = vector.extract_strided_slice %203 {offsets = [5, 0], sizes = [1, 128], strides = [1, 1]} : vector<16x128xf32> to vector<1x128xf32>
    %292 = vector.broadcast %210 : vector<2x1xf32> to vector<2x128xf32>
    %293 = vector.broadcast %291 : vector<1x128xf32> to vector<2x128xf32>
    %294 = arith.mulf %292, %293 : vector<2x128xf32>
    %295 = vector.extract_strided_slice %203 {offsets = [13, 0], sizes = [1, 128], strides = [1, 1]} : vector<16x128xf32> to vector<1x128xf32>
    %296 = vector.broadcast %214 : vector<2x1xf32> to vector<2x128xf32>
    %297 = vector.broadcast %295 : vector<1x128xf32> to vector<2x128xf32>
    %298 = arith.mulf %296, %297 : vector<2x128xf32>
    %299 = arith.addf %294, %298 : vector<2x128xf32>
    %300 = vector.broadcast %205 : vector<1x128xf32> to vector<2x128xf32>
    %301 = arith.addf %299, %300 : vector<2x128xf32>
    %302 = arith.truncf %290 : vector<2x128xf32> to vector<2x128xbf16>
    %cst_81 = arith.constant dense<0.000000e+00> : vector<2x128xf32>
    %303 = tpu.matmul %302, %204, %cst_81 {dimension_numbers = #tpu.dot_dimension_numbers<[1], [0], [0], [1], [0, 0, 1, 1], [], []>} : vector<2x128xbf16>, vector<128x128xbf16>, vector<2x128xf32> -> vector<2x128xf32>
    %304 = arith.addf %301, %303 : vector<2x128xf32>
    %305 = math.tanh %304 : vector<2x128xf32>
    %306 = vector.extract_strided_slice %203 {offsets = [6, 0], sizes = [1, 128], strides = [1, 1]} : vector<16x128xf32> to vector<1x128xf32>
    %307 = vector.broadcast %210 : vector<2x1xf32> to vector<2x128xf32>
    %308 = vector.broadcast %306 : vector<1x128xf32> to vector<2x128xf32>
    %309 = arith.mulf %307, %308 : vector<2x128xf32>
    %310 = vector.extract_strided_slice %203 {offsets = [14, 0], sizes = [1, 128], strides = [1, 1]} : vector<16x128xf32> to vector<1x128xf32>
    %311 = vector.broadcast %214 : vector<2x1xf32> to vector<2x128xf32>
    %312 = vector.broadcast %310 : vector<1x128xf32> to vector<2x128xf32>
    %313 = arith.mulf %311, %312 : vector<2x128xf32>
    %314 = arith.addf %309, %313 : vector<2x128xf32>
    %315 = vector.broadcast %205 : vector<1x128xf32> to vector<2x128xf32>
    %316 = arith.addf %314, %315 : vector<2x128xf32>
    %317 = arith.truncf %305 : vector<2x128xf32> to vector<2x128xbf16>
    %cst_82 = arith.constant dense<0.000000e+00> : vector<2x128xf32>
    %318 = tpu.matmul %317, %204, %cst_82 {dimension_numbers = #tpu.dot_dimension_numbers<[1], [0], [0], [1], [0, 0, 1, 1], [], []>} : vector<2x128xbf16>, vector<128x128xbf16>, vector<2x128xf32> -> vector<2x128xf32>
    %319 = arith.addf %316, %318 : vector<2x128xf32>
    %320 = math.tanh %319 : vector<2x128xf32>
    %321 = vector.extract_strided_slice %203 {offsets = [7, 0], sizes = [1, 128], strides = [1, 1]} : vector<16x128xf32> to vector<1x128xf32>
    %322 = vector.broadcast %210 : vector<2x1xf32> to vector<2x128xf32>
    %323 = vector.broadcast %321 : vector<1x128xf32> to vector<2x128xf32>
    %324 = arith.mulf %322, %323 : vector<2x128xf32>
    %325 = vector.extract_strided_slice %203 {offsets = [15, 0], sizes = [1, 128], strides = [1, 1]} : vector<16x128xf32> to vector<1x128xf32>
    %326 = vector.broadcast %214 : vector<2x1xf32> to vector<2x128xf32>
    %327 = vector.broadcast %325 : vector<1x128xf32> to vector<2x128xf32>
    %328 = arith.mulf %326, %327 : vector<2x128xf32>
    %329 = arith.addf %324, %328 : vector<2x128xf32>
    %330 = vector.broadcast %205 : vector<1x128xf32> to vector<2x128xf32>
    %331 = arith.addf %329, %330 : vector<2x128xf32>
    %332 = arith.truncf %320 : vector<2x128xf32> to vector<2x128xbf16>
    %cst_83 = arith.constant dense<0.000000e+00> : vector<2x128xf32>
    %333 = tpu.matmul %332, %204, %cst_83 {dimension_numbers = #tpu.dot_dimension_numbers<[1], [0], [0], [1], [0, 0, 1, 1], [], []>} : vector<2x128xbf16>, vector<128x128xbf16>, vector<2x128xf32> -> vector<2x128xf32>
    %334 = arith.addf %331, %333 : vector<2x128xf32>
    %335 = math.tanh %334 : vector<2x128xf32>
    %336 = arith.truncf %335 : vector<2x128xf32> to vector<2x128xbf16>
    %c0_84 = arith.constant 0 : index
    %c0_85 = arith.constant 0 : index
    %337 = vector.load %arg18[%c0_84, %c0_85] : memref<128x128xbf16, #tpu.memory_space<vmem>>, vector<128x128xbf16>
    %cst_86 = arith.constant dense<0.000000e+00> : vector<2x128xf32>
    %338 = tpu.matmul %336, %337, %cst_86 {dimension_numbers = #tpu.dot_dimension_numbers<[1], [0], [0], [1], [0, 0, 1, 1], [], []>} : vector<2x128xbf16>, vector<128x128xbf16>, vector<2x128xf32> -> vector<2x128xf32>
    %c0_87 = arith.constant 0 : index
    %c0_88 = arith.constant 0 : index
    %339 = vector.load %arg19[%c0_87, %c0_88] : memref<1x128xf32, #tpu.memory_space<vmem>>, vector<1x128xf32>
    %340 = vector.broadcast %339 : vector<1x128xf32> to vector<2x128xf32>
    %341 = arith.addf %338, %340 : vector<2x128xf32>
    %c0_89 = arith.constant 0 : index
    %c0_90 = arith.constant 0 : index
    %342 = vector.load %arg20[%c0_89, %c0_90] : memref<2x128xf32, #tpu.memory_space<vmem>>, vector<2x128xf32>
    tpu.vector_store %arg20[%c0_89, %c0_90], %341 {strides = array<i32>} : memref<2x128xf32, #tpu.memory_space<vmem>>, vector<2x128xf32>,
    return
  }
}

</mosaic_0001>

<bundles_post_ra>
// kernel: tpu_custom_call.1
= control target key start
LH: loop header
LB: loop body
LE: loop exit
PB: predicated region body
PF: predicated region fallthrough
CT: control target
= control target key end

     0   :  { %s3437_s0 = inlined_call_operand.vmem [shape: s32[16,1], index: 0, kind: input, shape index: {}]   ;;  %s3438_s1 = inlined_call_operand.hbm [shape: f32[128,128], index: 1, kind: input, shape index: {}]   ;;  %s3439_s2 = inlined_call_operand.hbm [shape: bf16[128,768], index: 2, kind: input, shape index: {}]   ;;  %s3440_s3 = inlined_call_operand.vmem [shape: f32[1,768], index: 3, kind: input, shape index: {}]   ;;  %s3441_s4 = inlined_call_operand.hbm [shape: bf16[256,128], index: 4, kind: input, shape index: {}]   ;;  %s3442_s5 = inlined_call_operand.vmem [shape: f32[1,128], index: 5, kind: input, shape index: {}]   ;;  %s3443_s6 = inlined_call_operand.vmem [shape: f32[1,128], index: 6, kind: input, shape index: {}]   ;;  %s3444_s7 = inlined_call_operand.vmem [shape: f32[1,128], index: 7, kind: input, shape index: {}]   ;;  %s3445_s8 = inlined_call_operand.hbm [shape: bf16[128,512], index: 8, kind: input, shape index: {}]   ;;  %s3446_s9 = inlined_call_operand.vmem [shape: f32[1,512], index: 9, kind: input, shape index: {}]   ;;  %s3447_s10 = inlined_call_operand.hbm [shape: bf16[512,128], index: 10, kind: input, shape index: {}]   ;;  %s3448_s11 = inlined_call_operand.vmem [shape: f32[1,128], index: 11, kind: input, shape index: {}]   ;;  %s3449_s12 = inlined_call_operand.vmem [shape: f32[1,128], index: 12, kind: input, shape index: {}]   ;;  %s3450_s13 = inlined_call_operand.vmem [shape: f32[1,128], index: 13, kind: input, shape index: {}]   ;;  %s3451_s14 = inlined_call_operand.hbm [shape: bf16[128,128], index: 14, kind: input, shape index: {}]   ;;  %s3452_s15 = inlined_call_operand.vmem [shape: f32[1,128], index: 15, kind: input, shape index: {}]   ;;  %s3453_s16 = inlined_call_operand.hbm [shape: bf16[128,128], index: 16, kind: input, shape index: {}]   ;;  %s3454_s17 = inlined_call_operand.vmem [shape: f32[1,128], index: 17, kind: input, shape index: {}]   ;;  %s3455_s18 = inlined_call_operand.hbm [shape: bf16[128,128], index: 18, kind: input, shape index: {}]   ;;  %s3456_s19 = inlined_call_operand.vmem [shape: f32[1,128], index: 19, kind: input, shape index: {}]   ;;  %s3457_s20 = inlined_call_operand.hbm [shape: f32[2,128], index: 20, kind: output, shape index: {}]  }
   0x1   :  { %3459 = sst [smem:[#allocation23_spill]] %s3437_s0 }
   0x2   :  { %3460 = sst [smem:[#allocation24_spill]] %s3438_s1 }
   0x3   :  { %3461 = sst [smem:[#allocation25_spill]] %s3439_s2 }
   0x4   :  { %3462 = sst [smem:[#allocation26_spill]] %s3440_s3 }
   0x5   :  { %3463 = sst [smem:[#allocation27_spill]] %s3441_s4 }
   0x6   :  { %3464 = sst [smem:[#allocation28_spill]] %s3456_s19 }
   0x7   :  { %3465 = sst [smem:[#allocation29_spill]] %s3457_s20 }
   0x8   :  { %25 = vsyncpa [#allocation3], 0 }
   0x9   :  { %26 = vsyncpa [#allocation6], 0 }
   0xa   :  { %27 = vsyncpa [#allocation9], 0 }
   0xb   :  { %28 = vsyncpa [#allocation12], 0 }
   0xc   :  { %29 = vsyncpa [#allocation15], 0  ;;  %s3466_s23 = sld [smem:[#allocation25_spill]] }
  0x12   :  { %s50_s24 = sshll.u32 %s3466_s23, 4  ;;  %s51_s24 = int_to_ptr.hbm [resolvable:$true] %s50_s24 }
  0x13   :  { %30 = vsyncpa [#allocation4], 0  ;;  %s3069_s2 = smov [#allocation5]   ;;  %s84_s27 = sshll.u32 %s3445_s8, 4  ;;  %s85_s27 = int_to_ptr.hbm [resolvable:$true] %s84_s27 }
  0x14   :  { %s52_s25 = sshll.u32 %s3069_s2, 4  ;;  %s3070_s28 = smov 384   ;;  %s53_s25 = int_to_ptr.vmem [resolvable:$true] %s52_s25 }
  0x15   :  { %s3071_s4 = smov 24   ;;  %s3072_s29 = smov [#allocation8]  }
  0x16   :  { %58 = dma.hbm_to_vmem [thread:$0]  %s51_s24, 6144, %s53_s25, [#allocation6], %s3070_s28, %s3070_s28, %s3071_s4  }
  0x17   :  { %s86_s30 = sshll.u32 %s3072_s29, 4  ;;  %s3073_s0 = smov 256   ;;  %s87_s30 = int_to_ptr.vmem [resolvable:$true] %s86_s30 }
  0x18   :  { %s3074_s21 = smov 16   ;;  %s118_s23 = sshll.u32 %s3451_s14, 4  ;;  %s119_s23 = int_to_ptr.hbm [resolvable:$true] %s118_s23 }
  0x19   :  { %92 = dma.hbm_to_vmem [thread:$0]  %s85_s27, 4096, %s87_s30, [#allocation9], %s3073_s0, %s3073_s0, %s3074_s21  }
  0x1a   :  { %s3075_s2 = smov [#allocation11]   ;;  %s3467_s26 = sld [smem:[#allocation24_spill]] }
  0x1b   :  { %s120_s20 = sshll.u32 %s3075_s2, 4  ;;  %s3076_s24 = smov 64   ;;  %s121_s20 = int_to_ptr.vmem [resolvable:$true] %s120_s20 }
  0x1c   :  { %s3077_s25 = smov 4   ;;  %s3078_s27 = smov [#allocation2]  }
  0x1d   :  { %126 = dma.hbm_to_vmem [thread:$0]  %s119_s23, 1024, %s121_s20, [#allocation12], %s3076_s24, %s3076_s24, %s3077_s25  }
  0x1e   :  { %s39_s28 = sshll.u32 %s3078_s27, 4  ;;  %s3079_s4 = smov 128   ;;  %s40_s28 = int_to_ptr.vmem [resolvable:$true] %s39_s28 }
  0x1f   :  { %s3080_s14 = smov 8   ;;  %s3468_s0 = sld [smem:[#allocation27_spill]] }
  0x20   :  { %s37_s19 = sshll.u32 %s3467_s26, 4  ;;  %s3081_s1 = smov [#allocation7]   ;;  %s38_s19 = int_to_ptr.hbm [resolvable:$true] %s37_s19 }
  0x21   :  { %45 = dma.hbm_to_vmem [thread:$0]  %s38_s19, 2048, %s40_s28, [#allocation3], %s3079_s4, %s3079_s4, %s3080_s14  }
  0x22   :  { %s67_s22 = sshll.u32 %s3081_s1, 4  ;;  %s99_s8 = sshll.u32 %s3447_s10, 4  ;;  %s68_s22 = int_to_ptr.vmem [resolvable:$true] %s67_s22  ;;  %s100_s8 = int_to_ptr.hbm [resolvable:$true] %s99_s8 }
  0x23   :  { %s3082_s20 = smov [#allocation10]   ;;  %s133_s27 = sshll.u32 %s3453_s16, 4  ;;  %s134_s27 = int_to_ptr.hbm [resolvable:$true] %s133_s27 }
  0x24   :  { %s101_s23 = sshll.u32 %s3082_s20, 4  ;;  %s148_s10 = sshll.u32 %s3455_s18, 4  ;;  %s102_s23 = int_to_ptr.vmem [resolvable:$true] %s101_s23  ;;  %s149_s10 = int_to_ptr.hbm [resolvable:$true] %s148_s10 }
  0x25   :  { %s65_s21 = sshll.u32 %s3468_s0, 4  ;;  %s3083_s14 = smov [#allocation13]   ;;  %s66_s21 = int_to_ptr.hbm [resolvable:$true] %s65_s21 }
  0x26   :  { %73 = dma.hbm_to_vmem [thread:$0]  %s66_s21, 2048, %s68_s22, [#allocation6], %s3076_s24, %s3076_s24, %s3077_s25  }
  0x27   :  { %107 = dma.hbm_to_vmem [thread:$0]  %s100_s8, 4096, %s102_s23, [#allocation9], %s3076_s24, %s3076_s24, %s3077_s25  }
  0x28   :  { %s135_s29 = sshll.u32 %s3083_s14, 4  ;;  %s3084_s30 = smov [#allocation14]   ;;  %s136_s29 = int_to_ptr.vmem [resolvable:$true] %s135_s29 }
  0x29   :  { %141 = dma.hbm_to_vmem [thread:$0]  %s134_s27, 1024, %s136_s29, [#allocation12], %s3076_s24, %s3076_s24, %s3077_s25  }
  0x2a   :  { %s150_s16 = sshll.u32 %s3084_s30, 4  ;;  %s151_s16 = int_to_ptr.vmem [resolvable:$true] %s150_s16 }
  0x2b   :  { %156 = dma.hbm_to_vmem [thread:$0]  %s149_s10, 1024, %s151_s16, [#allocation15], %s3076_s24, %s3076_s24, %s3077_s25  }
  0x2c   :  { %3057 = dma.done.wait [#allocation3], 2048  }
  0x2d   :  { %3058 = vsyncadd [#allocation3], 4294965248 }
  0x2e   :  { %3059 = dma.done.wait [#allocation6], 8192  }
  0x2f   :  { %3060 = vsyncadd [#allocation6], 4294959104 }
  0x30   :  { %3061 = dma.done.wait [#allocation9], 8192  }
  0x31   :  { %3062 = vsyncadd [#allocation9], 4294959104 }
  0x32   :  { %3063 = dma.done.wait [#allocation12], 2048  }
  0x33   :  { %3064 = vsyncadd [#allocation12], 4294965248 }
  0x34   :  { %3065 = dma.done.wait [#allocation15], 1024  }
  0x35   :  { %3066 = vsyncadd [#allocation15], 4294966272  ;;  %v3085_v0 = vmov 0   ;;  %s3469_s21 = sld [smem:[#allocation23_spill]]  ;;  %v223_v2 = vld [vmem:[#allocation2 + $0x78] sm:$0xff]  ;;  %v222_v3 = vld [vmem:[#allocation2 + $0x70] sm:$0xff] }
  0x36   :  { %2791 = vset.pattern.permute.xlu0 %v3085_v0  ;;  %224 = vmatpush.msra.mxu0 %v223_v2  ;;  %v221_v4 = vld [vmem:[#allocation2 + $0x68] sm:$0xff]  ;;  %v220_v5 = vld [vmem:[#allocation2 + $0x60] sm:$0xff]  ;;  %v219_v7 = vld [vmem:[#allocation2 + $0x58] sm:$0xff]  ;;  %s3470_s2 = sld [smem:[#allocation26_spill]]  ;;  %s3088_s30 = smov [#allocation16]  }
  0x37   :  { %v218_v8 = vld [vmem:[#allocation2 + $0x50] sm:$0xff]  ;;  %v217_v9 = vld [vmem:[#allocation2 + $0x48] sm:$0xff]  ;;  %v216_v10 = vld [vmem:[#allocation2 + $0x40] sm:$0xff]  ;;  %s3471_s29 = sld [smem:[#allocation28_spill]]  ;;  %s1988_s16 = sshll.u32 %s3088_s30, 4  ;;  %s1989_s16 = int_to_ptr.vmem [resolvable:$true] %s1988_s16 }
  0x38   :  { %225 = vmatpush.msra.mxu0 %v222_v3  ;;  %v215_v11 = vld [vmem:[#allocation2 + $0x38] sm:$0xff]  ;;  %v214_v12 = vld [vmem:[#allocation2 + $0x30] sm:$0xff]  ;;  %v213_v13 = vld [vmem:[#allocation2 + $0x28] sm:$0xff] }
  0x39   :  { %v212_v14 = vld [vmem:[#allocation2 + $0x20] sm:$0xff]  ;;  %v211_v15 = vld [vmem:[#allocation2 + $0x18] sm:$0xff]  ;;  %v210_v16 = vld [vmem:[#allocation2 + $0x10] sm:$0xff] }
  0x3a   :  { %226 = vmatpush.msra.mxu0 %v221_v4  ;;  %v209_v17 = vld [vmem:[#allocation2 + $0x8] sm:$0xff]  ;;  %v208_v18 = vld [vmem:[#allocation2] sm:$0xff]  ;;  %v2179_v19 = vld [vmem:[#allocation5 + $0x150] sm:$0xf] }
  0x3b   :  { %v192_v1 = vld [vmem:[%s3469_s21] sm:$0xff]  ;;  %v193_v6 = vld [vmem:[%s3469_s21 + $0x8] sm:$0xff]  ;;  %v2661_v21 = vld [vmem:[#allocation5 + $0x154] sm:$0xf]  ;;  %s3472_s21 = sld [smem:[#allocation29_spill]] }
  0x3c   :  { %197 = vperm.xlu0 %2791, %v192_v1   ;;  %227 = vmatpush.msra.mxu0 %v220_v5  ;;  %v2664_v20 = vld [vmem:[#allocation5 + $0x164] sm:$0xf0]  ;;  %v2181_v23 = vld [vmem:[#allocation5 + $0x168] sm:$0xf0]  ;;  %v2155_v24 = vld [vmem:[#allocation5 + $0x120] sm:$0xf] }
  0x3d   :  { %v2180_v22 = vor.u32 %v2664_v20, %v2179_v19  ;;  %v2658_v25 = vld [vmem:[#allocation5 + $0x134] sm:$0xf0]  ;;  %v2184_v26 = vor.u32 %v2661_v21, %v2181_v23  ;;  %v2655_v27 = vld [vmem:[#allocation5 + $0x124] sm:$0xf]  ;;  %v2157_v28 = vld [vmem:[#allocation5 + $0x138] sm:$0xf0] }
  0x3e   :  { %228 = vmatpush.msra.mxu0 %v219_v7  ;;  %v2156_v29 = vor.u32 %v2658_v25, %v2155_v24  ;;  %v2160_v30 = vor.u32 %v2655_v27, %v2157_v28  ;;  %v2131_v31 = vld [vmem:[#allocation5 + $0xf0] sm:$0xf]  ;;  %v2652_v32 = vld [vmem:[#allocation5 + $0x104] sm:$0xf0]  ;;  %v2649_v33 = vld [vmem:[#allocation5 + $0xf4] sm:$0xf] }
  0x3f   :  { %553 = vmatpush.bf16.msra.mxu1 %v2180_v22  ;;  %567 = vmatpush.bf16.msra.mxu2 %v2184_v26  ;;  %v2133_v34 = vld [vmem:[#allocation5 + $0x108] sm:$0xf0]  ;;  %v2187_v35 = vld [vmem:[#allocation5 + $0x158] sm:$0xf]  ;;  %v2665_v36 = vld [vmem:[#allocation5 + $0x16c] sm:$0xf0]  ;;  %v2132_v40 = vor.u32 %v2652_v32, %v2131_v31 }
  0x40   :  { %229 = vmatpush.msra.mxu0 %v218_v8  ;;  %v2188_v37 = vor.u32 %v2665_v36, %v2187_v35  ;;  %v2662_v38 = vld [vmem:[#allocation5 + $0x15c] sm:$0xf]  ;;  %v2189_v39 = vld [vmem:[#allocation5 + $0x170] sm:$0xf0]  ;;  %v2107_v41 = vld [vmem:[#allocation5 + $0xc0] sm:$0xf]  ;;  %v2136_v44 = vor.u32 %v2649_v33, %v2133_v34 }
  0x41   :  { %v2646_v42 = vld [vmem:[#allocation5 + $0xd4] sm:$0xf0]  ;;  %v2192_v43 = vor.u32 %v2662_v38, %v2189_v39  ;;  %v2163_v45 = vld [vmem:[#allocation5 + $0x128] sm:$0xf]  ;;  %v2659_v46 = vld [vmem:[#allocation5 + $0x13c] sm:$0xf0] }
  0x42   :  { %230 = vmatpush.msra.mxu0 %v217_v9  ;;  %581 = vmatpush.bf16.msra.mxu3 %v2188_v37  ;;  %v2656_v47 = vld [vmem:[#allocation5 + $0x12c] sm:$0xf]  ;;  %v2643_v48 = vld [vmem:[#allocation5 + $0xc4] sm:$0xf]  ;;  %v2109_v49 = vld [vmem:[#allocation5 + $0xd8] sm:$0xf0]  ;;  %v2164_v50 = vor.u32 %v2659_v46, %v2163_v45  ;;  %v2108_v54 = vor.u32 %v2646_v42, %v2107_v41 }
  0x43   :  { %554 = vmatpush.bf16.msra.mxu1 %v2156_v29  ;;  %568 = vmatpush.bf16.msra.mxu2 %v2160_v30  ;;  %v2165_v51 = vld [vmem:[#allocation5 + $0x140] sm:$0xf0]  ;;  %v2139_v53 = vld [vmem:[#allocation5 + $0xf8] sm:$0xf]  ;;  %v2653_v55 = vld [vmem:[#allocation5 + $0x10c] sm:$0xf0]  ;;  %v2112_v58 = vor.u32 %v2643_v48, %v2109_v49 }
  0x44   :  { %200 = vperm.xlu0 %2791, %v193_v6   ;;  %231 = vmatpush.msra.mxu0 %v216_v10  ;;  %v2168_v52 = vor.u32 %v2656_v47, %v2165_v51  ;;  %v2650_v56 = vld [vmem:[#allocation5 + $0xfc] sm:$0xf]  ;;  %v2141_v57 = vld [vmem:[#allocation5 + $0x110] sm:$0xf0]  ;;  %v2083_v59 = vld [vmem:[#allocation5 + $0x90] sm:$0xf]  ;;  %v2140_v62 = vor.u32 %v2653_v55, %v2139_v53  ;;  %v194_v6 = vlaneseq }
  0x45   :  { %v2640_v60 = vld [vmem:[#allocation5 + $0xa4] sm:$0xf0]  ;;  %v2637_v61 = vld [vmem:[#allocation5 + $0x94] sm:$0xf]  ;;  %v2085_v63 = vld [vmem:[#allocation5 + $0xa8] sm:$0xf0]  ;;  %v2144_v1 = vor.u32 %v2650_v56, %v2141_v57 }
  0x46   :  { %232 = vmatpush.msra.mxu0 %v215_v11  ;;  %582 = vmatpush.bf16.msra.mxu3 %v2164_v50  ;;  %v2115_v2 = vld [vmem:[#allocation5 + $0xc8] sm:$0xf]  ;;  %v2647_v3 = vld [vmem:[#allocation5 + $0xdc] sm:$0xf0]  ;;  %v2644_v4 = vld [vmem:[#allocation5 + $0xcc] sm:$0xf]  ;;  %v2084_v7 = vor.u32 %v2640_v60, %v2083_v59  ;;  %v2088_v8 = vor.u32 %v2637_v61, %v2085_v63 }
  0x47   :  { %555 = vmatpush.bf16.msra.mxu1 %v2132_v40  ;;  %569 = vmatpush.bf16.msra.mxu2 %v2136_v44  ;;  %v2117_v5 = vld [vmem:[#allocation5 + $0xe0] sm:$0xf0]  ;;  %v2059_v9 = vld [vmem:[#allocation5 + $0x60] sm:$0xf]  ;;  %v2634_v10 = vld [vmem:[#allocation5 + $0x74] sm:$0xf0]  ;;  %v2116_v11 = vor.u32 %v2647_v3, %v2115_v2 }
  0x48   :  { %233 = vmatpush.msra.mxu0 %v214_v12  ;;  %v2631_v12 = vld [vmem:[#allocation5 + $0x64] sm:$0xf]  ;;  %v3241_v19 = vand.u32 127, %v194_v6  ;;  %v2060_v20 = vor.u32 %v2634_v10, %v2059_v9  ;;  %v2035_v22 = vld [vmem:[#allocation5 + $0x30] sm:$0xf]  ;;  %v3086_v30 = vmov 1.0  }
  0x49   :  { %v2628_v23 = vld [vmem:[#allocation5 + $0x44] sm:$0xf0]  ;;  %v2625_v24 = vld [vmem:[#allocation5 + $0x34] sm:$0xf]  ;;  %v2037_v25 = vld [vmem:[#allocation5 + $0x48] sm:$0xf0] }
  0x4a   :  { %234 = vmatpush.msra.mxu0 %v213_v13  ;;  %583 = vmatpush.bf16.msra.mxu3 %v2140_v62  ;;  %v2061_v13 = vld [vmem:[#allocation5 + $0x78] sm:$0xf0]  ;;  %v2036_v29 = vor.u32 %v2628_v23, %v2035_v22  ;;  %v2040_v31 = vor.u32 %v2625_v24, %v2037_v25  ;;  %v2011_v32 = vld [vmem:[#allocation5] sm:$0xf]  ;;  %v2622_v33 = vld [vmem:[#allocation5 + $0x14] sm:$0xf0] }
  0x4b   :  { %556 = vmatpush.bf16.msra.mxu1 %v2108_v54  ;;  %570 = vmatpush.bf16.msra.mxu2 %v2112_v58  ;;  %v2064_v21 = vor.u32 %v2631_v12, %v2061_v13  ;;  %v2619_v34 = vld [vmem:[#allocation5 + $0x4] sm:$0xf]  ;;  %v2013_v35 = vld [vmem:[#allocation5 + $0x18] sm:$0xf0]  ;;  %v2195_v36 = vld [vmem:[#allocation5 + $0x160] sm:$0xf]  ;;  %v2012_v40 = vor.u32 %v2622_v33, %v2011_v32 }
  0x4c   :  { %235 = vmatpush.msra.mxu0 %v212_v14  ;;  %v2120_v14 = vor.u32 %v2644_v4, %v2117_v5  ;;  %v2666_v37 = vld [vmem:[#allocation5 + $0x174] sm:$0xf0]  ;;  %v2663_v38 = vld [vmem:[#allocation5 + $0x164] sm:$0xf]  ;;  %v2197_v39 = vld [vmem:[#allocation5 + $0x178] sm:$0xf0]  ;;  %v2016_v41 = vor.u32 %v2619_v34, %v2013_v35 }
  0x4d   :  { %v2196_v42 = vor.u32 %v2666_v37, %v2195_v36  ;;  %v2067_v45 = vld [vmem:[#allocation5 + $0x68] sm:$0xf]  ;;  %v2635_v46 = vld [vmem:[#allocation5 + $0x7c] sm:$0xf0]  ;;  %v2632_v47 = vld [vmem:[#allocation5 + $0x6c] sm:$0xf] }
  0x4e   :  { %236 = vmatpush.msra.mxu0 %v211_v15  ;;  %v2091_v15 = vld [vmem:[#allocation5 + $0x98] sm:$0xf]  ;;  %584 = vmatpush.bf16.msra.mxu3 %v2116_v11  ;;  %v2068_v48 = vor.u32 %v2635_v46, %v2067_v45  ;;  %v2069_v49 = vld [vmem:[#allocation5 + $0x80] sm:$0xf0]  ;;  %v2171_v50 = vld [vmem:[#allocation5 + $0x130] sm:$0xf] }
  0x4f   :  { %557 = vmatpush.bf16.msra.mxu1 %v2084_v7  ;;  %571 = vmatpush.bf16.msra.mxu2 %v2088_v8  ;;  %v2660_v51 = vld [vmem:[#allocation5 + $0x144] sm:$0xf0]  ;;  %v2657_v54 = vld [vmem:[#allocation5 + $0x134] sm:$0xf]  ;;  %v2173_v55 = vld [vmem:[#allocation5 + $0x148] sm:$0xf0] }
  0x50   :  { %237 = vmatpush.msra.mxu0 %v210_v16  ;;  %v2641_v16 = vld [vmem:[#allocation5 + $0xac] sm:$0xf0]  ;;  %v2172_v53 = vor.u32 %v2660_v51, %v2171_v50  ;;  %v2176_v56 = vor.u32 %v2657_v54, %v2173_v55  ;;  %v2043_v57 = vld [vmem:[#allocation5 + $0x38] sm:$0xf]  ;;  %v2626_v59 = vld [vmem:[#allocation5 + $0x3c] sm:$0xf] }
  0x51   :  { %v2092_v26 = vor.u32 %v2641_v16, %v2091_v15  ;;  %v2629_v58 = vld [vmem:[#allocation5 + $0x4c] sm:$0xf0]  ;;  %v2045_v61 = vld [vmem:[#allocation5 + $0x50] sm:$0xf0]  ;;  %v2147_v62 = vld [vmem:[#allocation5 + $0x100] sm:$0xf] }
  0x52   :  { %238 = vmatpush.msra.mxu0 %v209_v17  ;;  %v2638_v17 = vld [vmem:[#allocation5 + $0x9c] sm:$0xf]  ;;  %v2044_v60 = vor.u32 %v2629_v58, %v2043_v57  ;;  %v2654_v63 = vld [vmem:[#allocation5 + $0x114] sm:$0xf0]  ;;  %v2651_v3 = vld [vmem:[#allocation5 + $0x104] sm:$0xf] }
  0x53   :  { %558 = vmatpush.bf16.msra.mxu1 %v2060_v20  ;;  %572 = vmatpush.bf16.msra.mxu2 %v2064_v21  ;;  %v2148_v2 = vor.u32 %v2654_v63, %v2147_v62  ;;  %v2149_v4 = vld [vmem:[#allocation5 + $0x118] sm:$0xf0]  ;;  %v2019_v7 = vld [vmem:[#allocation5 + $0x8] sm:$0xf]  ;;  %v2623_v8 = vld [vmem:[#allocation5 + $0x1c] sm:$0xf0] }
  0x54   :  { %239 = vmatpush.msra.mxu0 %v208_v18  ;;  %v2093_v18 = vld [vmem:[#allocation5 + $0xb0] sm:$0xf0]  ;;  %585 = vmatpush.bf16.msra.mxu3 %v2092_v26  ;;  %v2152_v5 = vor.u32 %v2651_v3, %v2149_v4  ;;  %v2620_v9 = vld [vmem:[#allocation5 + $0xc] sm:$0xf]  ;;  %v2020_v10 = vor.u32 %v2623_v8, %v2019_v7  ;;  %v2021_v11 = vld [vmem:[#allocation5 + $0x20] sm:$0xf0] }
  0x55   :  { %v2096_v27 = vor.u32 %v2638_v17, %v2093_v18  ;;  %v2123_v12 = vld [vmem:[#allocation5 + $0xd0] sm:$0xf]  ;;  %v2648_v13 = vld [vmem:[#allocation5 + $0xe4] sm:$0xf0]  ;;  %v2645_v16 = vld [vmem:[#allocation5 + $0xd4] sm:$0xf] }
  0x56   :  { %595 = vmatpush.bf16.msrb.mxu0 %v2192_v43  ;;  %v2200_v43 = vor.u32 %v2663_v38, %v2197_v39  ;;  %v2124_v15 = vor.u32 %v2648_v13, %v2123_v12  ;;  %v2125_v17 = vld [vmem:[#allocation5 + $0xe8] sm:$0xf0]  ;;  %v2099_v20 = vld [vmem:[#allocation5 + $0xa0] sm:$0xf]  ;;  %v2642_v21 = vld [vmem:[#allocation5 + $0xb4] sm:$0xf0] }
  0x57   :  { %559 = vmatpush.bf16.msra.mxu1 %v2036_v29  ;;  %573 = vmatpush.bf16.msra.mxu2 %v2040_v31  ;;  %v2128_v18 = vor.u32 %v2645_v16, %v2125_v17  ;;  %v2639_v22 = vld [vmem:[#allocation5 + $0xa4] sm:$0xf]  ;;  %v2100_v23 = vor.u32 %v2642_v21, %v2099_v20  ;;  %v2101_v24 = vld [vmem:[#allocation5 + $0xb8] sm:$0xf0]  ;;  %v2075_v26 = vld [vmem:[#allocation5 + $0x70] sm:$0xf] }
  0x58   :  { %586 = vmatpush.bf16.msra.mxu3 %v2068_v48  ;;  %v2104_v25 = vor.u32 %v2639_v22, %v2101_v24  ;;  %v2051_v32 = vld [vmem:[#allocation5 + $0x40] sm:$0xf]  ;;  %v2630_v33 = vld [vmem:[#allocation5 + $0x54] sm:$0xf0]  ;;  %v2627_v34 = vld [vmem:[#allocation5 + $0x44] sm:$0xf] }
  0x59   :  { %v2053_v35 = vld [vmem:[#allocation5 + $0x58] sm:$0xf0]  ;;  %v2052_v36 = vor.u32 %v2630_v33, %v2051_v32  ;;  %v2027_v38 = vld [vmem:[#allocation5 + $0x10] sm:$0xf]  ;;  %v2624_v39 = vld [vmem:[#allocation5 + $0x24] sm:$0xf0] }
  0x5a   :  { %596 = vmatpush.bf16.msrb.mxu0 %v2168_v52  ;;  %v2072_v52 = vor.u32 %v2632_v47, %v2069_v49  ;;  %v2056_v37 = vor.u32 %v2627_v34, %v2053_v35  ;;  %v3254_v47 = vld [vmem:[%s3470_s2] sm:$0x3f]  ;;  %v2672_v16 = vld [vmem:[#allocation7 + $0x28] sm:$0xff]  ;;  %v2682_v17 = vld [vmem:[#allocation7 + $0x78] sm:$0xff]  ;;  %vm247_vm4 = vcmp.lt.s32.totalorder %v3241_v19, 100  ;;  %s1990_s24 = sshll.u32 %s3472_s21, 4  ;;  %s1991_s24 = int_to_ptr.hbm [resolvable:$true] %s1990_s24 }
  0x5b   :  { %560 = vmatpush.bf16.msra.mxu1 %v2012_v40  ;;  %574 = vmatpush.bf16.msra.mxu2 %v2016_v41  ;;  %v2621_v40 = vld [vmem:[#allocation5 + $0x14] sm:$0xf]  ;;  %v2029_v41 = vld [vmem:[#allocation5 + $0x28] sm:$0xf0]  ;;  %v304_v50 = vperm.slane %v3254_v47, 3  ;;  %v302_v51 = vperm.slane %v3254_v47, 1 }
  0x5c   :  { %587 = vmatpush.bf16.msra.mxu3 %v2044_v60  ;;  %v2681_v20 = vld [vmem:[#allocation7 + $0x70] sm:$0xff]  ;;  %v2670_v21 = vld [vmem:[#allocation7 + $0x18] sm:$0xff]  ;;  %v2680_v22 = vld [vmem:[#allocation7 + $0x68] sm:$0xff] }
  0x5d   :  { %v2667_v35 = vld [vmem:[#allocation7] sm:$0xff] }
  0x5e   :  { %597 = vmatpush.bf16.msrb.mxu0 %v2144_v1  ;;  %v2048_v1 = vor.u32 %v2626_v59, %v2045_v61 }
  0x5f   :  { %609 = vmatpush.bf16.msrb.mxu1 %v2196_v42  ;;  %623 = vmatpush.bf16.msrb.mxu2 %v2200_v43  ;;  %v2028_v42 = vor.u32 %v2624_v39, %v2027_v38  ;;  %v2032_v43 = vor.u32 %v2621_v40, %v2029_v41  ;;  %v2676_v41 = vld [vmem:[#allocation7 + $0x48] sm:$0xff] }
  0x60   :  { %588 = vmatpush.bf16.msra.mxu3 %v2020_v10 }
  0x62   :  { %598 = vmatpush.bf16.msrb.mxu0 %v2120_v14  ;;  %v2024_v14 = vor.u32 %v2620_v9, %v2021_v11 }
  0x63   :  { %610 = vmatpush.bf16.msrb.mxu1 %v2172_v53  ;;  %624 = vmatpush.bf16.msrb.mxu2 %v2176_v56  ;;  %v303_v53 = vperm.slane %v3254_v47, 2 }
  0x66   :  { %599 = vmatpush.bf16.msrb.mxu0 %v2096_v27  ;;  %v2636_v27 = vld [vmem:[#allocation5 + $0x84] sm:$0xf0] }
  0x67   :  { %611 = vmatpush.bf16.msrb.mxu1 %v2148_v2  ;;  %625 = vmatpush.bf16.msrb.mxu2 %v2152_v5  ;;  %v2076_v29 = vor.u32 %v2636_v27, %v2075_v26  ;;  %v2679_v26 = vld [vmem:[#allocation7 + $0x60] sm:$0xff]  ;;  %v2668_v27 = vld [vmem:[#allocation7 + $0x8] sm:$0xff] }
  0x6a   :  { %600 = vmatpush.bf16.msrb.mxu0 %v2072_v52  ;;  %v301_v52 = vperm.slane %v3254_v47, 0 }
  0x6b   :  { %612 = vmatpush.bf16.msrb.mxu1 %v2124_v15  ;;  %626 = vmatpush.bf16.msrb.mxu2 %v2128_v18  ;;  %v2673_v15 = vld [vmem:[#allocation7 + $0x30] sm:$0xff]  ;;  %v2671_v18 = vld [vmem:[#allocation7 + $0x20] sm:$0xff] }
  0x6e   :  { %601 = vmatpush.bf16.msrb.mxu0 %v2048_v1 }
  0x6f   :  { %613 = vmatpush.bf16.msrb.mxu1 %v2100_v23  ;;  %627 = vmatpush.bf16.msrb.mxu2 %v2104_v25  ;;  %v2669_v25 = vld [vmem:[#allocation7 + $0x10] sm:$0xff] }
  0x72   :  { %602 = vmatpush.bf16.msrb.mxu0 %v2024_v14  ;;  %v2674_v14 = vld [vmem:[#allocation7 + $0x38] sm:$0xff] }
  0x73   :  { %614 = vmatpush.bf16.msrb.mxu1 %v2076_v29  ;;  %839 = vmatpush.bf16.msrb.mxu3 %v2674_v14 }
  0x77   :  { %615 = vmatpush.bf16.msrb.mxu1 %v2052_v36  ;;  %840 = vmatpush.bf16.msrb.mxu3 %v2673_v15  ;;  %v2677_v36 = vld [vmem:[#allocation7 + $0x50] sm:$0xff] }
  0x7b   :  { %616 = vmatpush.bf16.msrb.mxu1 %v2028_v42  ;;  %841 = vmatpush.bf16.msrb.mxu3 %v2672_v16 }
  0x7f   :  { %842 = vmatpush.bf16.msrb.mxu3 %v2671_v18 }
  0x83   :  { %843 = vmatpush.bf16.msrb.mxu3 %v2670_v21  ;;  %v306_v21 = vperm.slane %v3254_v47, 5 }
  0x87   :  { %844 = vmatpush.bf16.msrb.mxu3 %v2669_v25 }
  0x8b   :  { %845 = vmatpush.bf16.msrb.mxu3 %v2668_v27 }
  0x8f   :  { %846 = vmatpush.bf16.msrb.mxu3 %v2667_v35 }
  0xae   :  { %v198_v28 = vpop.permute.xlu0 %197 }
  0xaf   :  { %vm202_vm0 = vcmp.eq.s32.totalorder %v3241_v19, %v198_v28  ;;  %v2633_v28 = vld [vmem:[#allocation5 + $0x74] sm:$0xf] }
  0xb0   :  { %2006 = vmatmul.msk.f32.vlgmr.msra.gmra.mxu0 %vm202_vm0, %v3086_v30 }
  0xb1   :  { %853 = vmatpush.bf16.msra.mxu0 %v2682_v17 }
  0xb5   :  { %854 = vmatpush.bf16.msra.mxu0 %v2681_v20 }
  0xb6   :  { %v201_v44 = vpop.permute.xlu0 %200 }
  0xb7   :  { %vm203_vm1 = vcmp.eq.s32.totalorder %v3241_v19, %v201_v44 }
  0xb8   :  { %2007 = vmatmul.msk.f32.gmra.mxu0 %vm203_vm1, %v3086_v30  ;;  %v2077_v30 = vld [vmem:[#allocation5 + $0x88] sm:$0xf0] }
  0xb9   :  { %v2080_v31 = vor.u32 %v2633_v28, %v2077_v30  ;;  %855 = vmatpush.bf16.msra.mxu0 %v2680_v22  ;;  %v2678_v28 = vld [vmem:[#allocation7 + $0x58] sm:$0xff] }
  0xbb   :  { %628 = vmatpush.bf16.msrb.mxu2 %v2080_v31 }
  0xbd   :  { %856 = vmatpush.bf16.msra.mxu0 %v2679_v26 }
  0xbf   :  { %629 = vmatpush.bf16.msrb.mxu2 %v2056_v37 }
  0xc1   :  { %857 = vmatpush.bf16.msra.mxu0 %v2678_v28 }
  0xc3   :  { %630 = vmatpush.bf16.msrb.mxu2 %v2032_v43  ;;  %v2675_v43 = vld [vmem:[#allocation7 + $0x40] sm:$0xff] }
  0xc5   :  { %858 = vmatpush.bf16.msra.mxu0 %v2677_v36 }
  0xc9   :  { %859 = vmatpush.bf16.msra.mxu0 %v2676_v41 }
  0xcd   :  { %860 = vmatpush.bf16.msra.mxu0 %v2675_v43 }
 0x12d   :  { %v3245_v44 = vpop.f32.mrf.mxu0 }
 0x135   :  { %v3247_v45 = vpop.f32.mrf.mxu0 }
 0x136   :  { %v250_v46 = vpack.c.bf16 %v3247_v45, %v3245_v44 }
 0x138   :  { %561 = vmatmul.bf16.vlgmr.msra.gmra.mxu1 %v250_v46  ;;  %575 = vmatmul.bf16.vlgmr.msra.gmra.mxu2 %v250_v46 }
 0x139   :  { %589 = vmatmul.bf16.vlgmr.msra.gmra.mxu3 %v250_v46  ;;  %603 = vmatmul.bf16.vlgmr.msrb.gmra.mxu0 %v250_v46 }
 0x148   :  { %617 = vmatmul.bf16.vlgmr.msrb.gmra.mxu1 %v250_v46  ;;  %631 = vmatmul.bf16.vlgmr.msrb.gmra.mxu2 %v250_v46 }
 0x1b5   :  { %v562_v48 = vpop.f32.mrf.mxu1 }
 0x1b6   :  { %v604_v49 = vpop.f32.mrf.mxu0  ;;  %v563_v58 = vadd.f32 %v562_v48, %v301_v52 }
 0x1b7   :  { %v605_v55 = vadd.f32 %v604_v49, %v304_v50 }
 0x1bb   :  { %v576_v54 = vpop.f32.mrf.mxu2 }
 0x1bc   :  { %v577_v56 = vadd.f32 %v576_v54, %v302_v51  ;;  %v590_v57 = vpop.f32.mrf.mxu3 }
 0x1bd   :  { %v591_v59 = vadd.f32 %v590_v57, %v303_v53  ;;  %v564_v60 = vpop.f32.mrf.mxu1 }
 0x1be   :  { %v565_v61 = vadd.f32 %v564_v60, %v301_v52  ;;  %v671_v62 = vmul.f32 %v605_v55, %v577_v56  ;;  %v606_v1 = vpop.f32.mrf.mxu0 }
 0x1bf   :  { %v637_v63 = vmul.f32 %v591_v59, %v563_v58  ;;  %v607_v3 = vadd.f32 %v606_v1, %v304_v50 }
 0x1c0   :  { %672 = vadd.xlane.f32.xlu0 %v671_v62  ;;  %v645_v2 = vmul.f32 %v591_v59, %v565_v61 }
 0x1c1   :  { %638 = vadd.xlane.f32.xlu1 %v637_v63  ;;  %v675_v7 = vmul.f32 %v607_v3, %v577_v56 }
 0x1c2   :  { %646 = vadd.xlane.f32.xlu2 %v645_v2 }
 0x1c3   :  { %v578_v9 = vpop.f32.mrf.mxu2 }
 0x1c4   :  { %v592_v4 = vpop.f32.mrf.mxu3  ;;  %v579_v10 = vadd.f32 %v578_v9, %v302_v51 }
 0x1c5   :  { %v593_v5 = vadd.f32 %v592_v4, %v303_v53 }
 0x1c6   :  { %v679_v12 = vmul.f32 %v605_v55, %v579_v10  ;;  %v683_v13 = vmul.f32 %v607_v3, %v579_v10  ;;  %v618_v55 = vpop.f32.mrf.mxu1 }
 0x1c7   :  { %v649_v8 = vmul.f32 %v593_v5, %v565_v61  ;;  %v641_v11 = vmul.f32 %v593_v5, %v563_v58  ;;  %v305_v5 = vperm.slane %v3254_v47, 4  ;;  %v2792_v47 = vld [vmem:[%s3442_s5] ss:$0 sm:$0xff] }
 0x1c9   :  { %676 = vadd.xlane.f32.xlu1 %v675_v7 }
 0x1ca   :  { %650 = vadd.xlane.f32.xlu2 %v649_v8 }
 0x1cb   :  { %v632_v3 = vpop.f32.mrf.mxu2 }
 0x1cc   :  { %v633_v28 = vadd.f32 %v632_v3, %v306_v21  ;;  %v2387_v3 = vld [vmem:[#allocation8 + $0xe8] sm:$0xf] }
 0x1ce   :  { %v620_v4 = vpop.f32.mrf.mxu1 }
 0x1cf   :  { %v621_v9 = vadd.f32 %v620_v4, %v305_v5  ;;  %v2714_v4 = vld [vmem:[#allocation8 + $0xf4] sm:$0xf0] }
 0x1d1   :  { %642 = vadd.xlane.f32.xlu1 %v641_v11 }
 0x1d2   :  { %680 = vadd.xlane.f32.xlu2 %v679_v12  ;;  %v619_v12 = vadd.f32 %v618_v55, %v305_v5 }
 0x1d3   :  { %v634_v20 = vpop.f32.mrf.mxu2 }
 0x1d4   :  { %v635_v25 = vadd.f32 %v634_v20, %v306_v21  ;;  %v2708_v21 = vld [vmem:[#allocation8 + $0xcc] sm:$0xf] }
 0x1d9   :  { %684 = vadd.xlane.f32.xlu1 %v683_v13 }
 0x233   :  { %v673_v29 = vpop.xlane.xlu0 %672 }
 0x234   :  { %v639_v23 = vpop.xlane.xlu1 %638  ;;  %v674_v37 = vmul.f32 0.14142136, %v673_v29 }
 0x235   :  { %v647_v24 = vpop.xlane.xlu2 %646  ;;  %v640_v46 = vmul.f32 0.14142136, %v639_v23 }
 0x236   :  { %v648_v33 = vmul.f32 0.14142136, %v647_v24 }
 0x23c   :  { %v677_v30 = vpop.xlane.xlu1 %676 }
 0x23d   :  { %v678_v31 = vmul.f32 0.14142136, %v677_v30  ;;  %v651_v32 = vpop.xlane.xlu2 %650 }
 0x23e   :  { %v652_v34 = vmul.f32 0.14142136, %v651_v32 }
 0x23f   :  { %v687_v39 = vsub.f32 %v678_v31, %v674_v37 }
 0x240   :  { %v658_v38 = vsub.f32 %v652_v34, %v648_v33 }
 0x241   :  { %v688_v48 = vmul.f32 1.442695, %v687_v39 }
 0x242   :  { %v659_v40 = vmul.f32 1.442695, %v658_v38 }
 0x244   :  { %2801 = vpow2.f32 %v659_v40  ;;  %v643_v42 = vpop.xlane.xlu1 %642 }
 0x245   :  { %v644_v49 = vmul.f32 0.14142136, %v643_v42  ;;  %2803 = vpow2.f32 %v688_v48  ;;  %v681_v53 = vpop.xlane.xlu2 %680 }
 0x246   :  { %v682_v57 = vmul.f32 0.14142136, %v681_v53 }
 0x247   :  { %v653_v50 = vsub.f32 %v644_v49, %v640_v46 }
 0x249   :  { %v654_v51 = vmul.f32 1.442695, %v653_v50  ;;  %v1667_v50 = vshrl.u32 %v194_v6, 7 }
 0x24a   :  { %v2802_v52 = vpop.eup %2801 }
 0x24b   :  { %v661_v54 = vadd.f32 1.0, %v2802_v52  ;;  %2805 = vpow2.f32 %v654_v51  ;;  %v2804_v59 = vpop.eup %2803  ;;  %vm1668_vm2 = vcmp.eq.s32.totalorder %v1667_v50, 0  ;;  %vm1671_vm3 = vcmp.eq.s32.totalorder %v1667_v50, 1  ;;  %v2315_v50 = vld [vmem:[#allocation8 + $0x60] sm:$0xf] }
 0x24c   :  { %v685_v56 = vpop.xlane.xlu1 %684  ;;  %v690_v63 = vadd.f32 1.0, %v2804_v59  ;;  %v3087_v51 = vmov 0.0  }
 0x24d   :  { %v686_v58 = vmul.f32 0.14142136, %v685_v56  ;;  %2807 = vrcp.f32 %v661_v54  ;;  %v3268_v52 = vsel %vm1668_vm2, 1.0, %v3087_v51  ;;  %v3270_v53 = vsel %vm1671_vm3, 1.0, %v3087_v51 }
 0x24e   :  { %v3273_v55 = vsel %vm247_vm4, 1.0, %v3087_v51  ;;  %v2697_v51 = vld [vmem:[#allocation8 + $0x6c] sm:$0xf0] }
 0x24f   :  { %v692_v60 = vsub.f32 %v686_v58, %v682_v57 }
 0x251   :  { %v2806_v61 = vpop.eup %2805  ;;  %v693_v62 = vmul.f32 1.442695, %v692_v60 }
 0x252   :  { %v656_v1 = vadd.f32 1.0, %v2806_v61  ;;  %v2379_v61 = vld [vmem:[#allocation8 + $0xe0] sm:$0xf] }
 0x253   :  { %2809 = vpow2.f32 %v693_v62  ;;  %v2808_v2 = vpop.eup %2807  ;;  %v2713_v62 = vld [vmem:[#allocation8 + $0xec] sm:$0xf0] }
 0x254   :  { %2811 = vrcp.f32 %v656_v1  ;;  %v668_v7 = vsub.f32 1.0, %v2808_v2  ;;  %v667_v18 = vmul.f32 %v2808_v2, %v619_v12  ;;  %v2380_v1 = vor.u32 %v2713_v62, %v2379_v61  ;;  %v2381_v2 = vld [vmem:[#allocation8 + $0xf0] sm:$0xf0]  ;;  %v2325_v61 = vld [vmem:[#allocation8 + $0x78] sm:$0xf0] }
 0x255   :  { %2813 = vrcp.f32 %v690_v63  ;;  %v2711_v63 = vld [vmem:[#allocation8 + $0xe4] sm:$0xf] }
 0x256   :  { %v669_v14 = vmul.f32 %v668_v7, %v621_v9  ;;  %v2384_v5 = vor.u32 %v2711_v63, %v2381_v2  ;;  %v2388_v7 = vor.u32 %v2714_v4, %v2387_v3  ;;  %1126 = vmatpush.bf16.msra.mxu1 %v2380_v1  ;;  %v2299_v63 = vld [vmem:[#allocation8 + $0x40] sm:$0xf]  ;;  %v2693_v1 = vld [vmem:[#allocation8 + $0x4c] sm:$0xf0]  ;;  %v2691_v2 = vld [vmem:[#allocation8 + $0x44] sm:$0xf] }
 0x257   :  { %v2300_v3 = vor.u32 %v2693_v1, %v2299_v63  ;;  %v2301_v4 = vld [vmem:[#allocation8 + $0x50] sm:$0xf0]  ;;  %v2719_v1 = vld [vmem:[#allocation10 + $0x20] sm:$0xff] }
 0x258   :  { %v670_v24 = vadd.f32 %v669_v14, %v667_v18  ;;  %1140 = vmatpush.bf16.msra.mxu2 %v2384_v5  ;;  %1154 = vmatpush.bf16.msra.mxu3 %v2388_v7  ;;  %v2307_v5 = vld [vmem:[#allocation8 + $0x48] sm:$0xf]  ;;  %v2694_v7 = vld [vmem:[#allocation8 + $0x54] sm:$0xf0] }
 0x259   :  { %v2810_v8 = vpop.eup %2809 }
 0x25a   :  { %v2812_v10 = vpop.eup %2811  ;;  %v695_v11 = vadd.f32 1.0, %v2810_v8  ;;  %v2712_v8 = vld [vmem:[#allocation8 + $0xec] sm:$0xf] }
 0x25b   :  { %v664_v13 = vsub.f32 1.0, %v2812_v10  ;;  %v2814_v15 = vpop.eup %2813  ;;  %v663_v16 = vmul.f32 %v2812_v10, %v619_v12  ;;  %v2709_v12 = vld [vmem:[#allocation8 + $0xcc] sm:$0xf0] }
 0x25c   :  { %2815 = vrcp.f32 %v695_v11  ;;  %v698_v22 = vsub.f32 1.0, %v2814_v15  ;;  %v697_v31 = vmul.f32 %v2814_v15, %v633_v28  ;;  %v2363_v11 = vld [vmem:[#allocation8 + $0xc0] sm:$0xf]  ;;  %v2365_v15 = vld [vmem:[#allocation8 + $0xd0] sm:$0xf0] }
 0x25d   :  { %v665_v17 = vmul.f32 %v664_v13, %v621_v9  ;;  %v2389_v9 = vld [vmem:[#allocation8 + $0xf8] sm:$0xf0]  ;;  %v2707_v13 = vld [vmem:[#allocation8 + $0xc4] sm:$0xf]  ;;  %v2364_v14 = vor.u32 %v2709_v12, %v2363_v11 }
 0x25e   :  { %v699_v30 = vmul.f32 %v698_v22, %v635_v25  ;;  %v2392_v10 = vor.u32 %v2712_v8, %v2389_v9  ;;  %v2368_v18 = vor.u32 %v2707_v13, %v2365_v15  ;;  %v2373_v22 = vld [vmem:[#allocation8 + $0xd8] sm:$0xf0]  ;;  %v2304_v8 = vor.u32 %v2691_v2, %v2301_v4  ;;  %v2283_v13 = vld [vmem:[#allocation8 + $0x20] sm:$0xf]  ;;  %v2687_v15 = vld [vmem:[#allocation8 + $0x24] sm:$0xf] }
 0x25f   :  { %v666_v23 = vadd.f32 %v665_v17, %v663_v16  ;;  %v2371_v16 = vld [vmem:[#allocation8 + $0xc8] sm:$0xf]  ;;  %v2710_v17 = vld [vmem:[#allocation8 + $0xd4] sm:$0xf0]  ;;  %1127 = vmatpush.bf16.msra.mxu1 %v2364_v14  ;;  %v2308_v9 = vor.u32 %v2694_v7, %v2307_v5  ;;  %v2309_v11 = vld [vmem:[#allocation8 + $0x58] sm:$0xf0] }
 0x260   :  { %v700_v34 = vadd.f32 %v699_v30, %v697_v31  ;;  %1168 = vmatpush.bf16.msrb.mxu0 %v2392_v10  ;;  %v2372_v20 = vor.u32 %v2710_v17, %v2371_v16  ;;  %1141 = vmatpush.bf16.msra.mxu2 %v2368_v18  ;;  %v2706_v30 = vld [vmem:[#allocation8 + $0xb4] sm:$0xf0]  ;;  %v2692_v10 = vld [vmem:[#allocation8 + $0x4c] sm:$0xf]  ;;  %v2689_v14 = vld [vmem:[#allocation8 + $0x2c] sm:$0xf0] }
 0x261   :  { %v705_v26 = vpack.c.bf16 %v670_v24, %v666_v23  ;;  %v2376_v23 = vor.u32 %v2708_v21, %v2373_v22  ;;  %v2347_v24 = vld [vmem:[#allocation8 + $0xa0] sm:$0xf]  ;;  %v2312_v12 = vor.u32 %v2692_v10, %v2309_v11  ;;  %v2284_v16 = vor.u32 %v2689_v14, %v2283_v13  ;;  %v2285_v17 = vld [vmem:[#allocation8 + $0x30] sm:$0xf0]  ;;  %v2291_v18 = vld [vmem:[#allocation8 + $0x28] sm:$0xf] }
 0x262   :  { %v2816_v27 = vpop.eup %2815  ;;  %1155 = vmatpush.bf16.msra.mxu3 %v2372_v20  ;;  %v2690_v20 = vld [vmem:[#allocation8 + $0x34] sm:$0xf0]  ;;  %v2288_v21 = vor.u32 %v2687_v15, %v2285_v17  ;;  %v2743_v2 = vld [vmem:[#allocation10 + $0xe0] sm:$0xff] }
 0x263   :  { %v702_v29 = vsub.f32 1.0, %v2816_v27  ;;  %847 = vmatmul.bf16.vlgmr.msrb.gmra.mxu3 %v705_v26  ;;  %v701_v32 = vmul.f32 %v2816_v27, %v633_v28  ;;  %v2703_v26 = vld [vmem:[#allocation8 + $0xa4] sm:$0xf]  ;;  %v2349_v28 = vld [vmem:[#allocation8 + $0xb0] sm:$0xf0]  ;;  %v2292_v22 = vor.u32 %v2690_v20, %v2291_v18 }
 0x264   :  { %1169 = vmatpush.bf16.msrb.mxu0 %v2376_v23  ;;  %v2352_v31 = vor.u32 %v2703_v26, %v2349_v28  ;;  %v2688_v23 = vld [vmem:[#allocation8 + $0x2c] sm:$0xf]  ;;  %v2685_v28 = vld [vmem:[#allocation8 + $0xc] sm:$0xf0]  ;;  %v2794_v17 = vld [vmem:[%s3444_s7] ss:$0 sm:$0xff] }
 0x265   :  { %v703_v33 = vmul.f32 %v702_v29, %v635_v25  ;;  %v2705_v25 = vld [vmem:[#allocation8 + $0xac] sm:$0xf0]  ;;  %v2355_v29 = vld [vmem:[#allocation8 + $0xa8] sm:$0xf] }
 0x266   :  { %v2348_v27 = vor.u32 %v2705_v25, %v2347_v24  ;;  %1142 = vmatpush.bf16.msra.mxu2 %v2352_v31  ;;  %v2293_v24 = vld [vmem:[#allocation8 + $0x38] sm:$0xf0]  ;;  %v2267_v25 = vld [vmem:[#allocation8] sm:$0xf] }
 0x267   :  { %v704_v35 = vadd.f32 %v703_v33, %v701_v32  ;;  %v2356_v32 = vor.u32 %v2706_v30, %v2355_v29  ;;  %v2704_v33 = vld [vmem:[#allocation8 + $0xac] sm:$0xf]  ;;  %v2683_v29 = vld [vmem:[#allocation8 + $0x4] sm:$0xf]  ;;  %v2269_v30 = vld [vmem:[#allocation8 + $0x10] sm:$0xf0] }
 0x268   :  { %1128 = vmatpush.bf16.msra.mxu1 %v2348_v27  ;;  %v2296_v27 = vor.u32 %v2688_v23, %v2293_v24  ;;  %v2742_v23 = vld [vmem:[#allocation10 + $0xd8] sm:$0xff]  ;;  %v2735_v24 = vld [vmem:[#allocation10 + $0xa0] sm:$0xff] }
 0x269   :  { %v706_v36 = vpack.c.bf16 %v704_v35, %v700_v34  ;;  %v2357_v34 = vld [vmem:[#allocation8 + $0xb8] sm:$0xf0]  ;;  %1156 = vmatpush.bf16.msra.mxu3 %v2356_v32  ;;  %v2268_v32 = vor.u32 %v2685_v28, %v2267_v25  ;;  %v2717_v25 = vld [vmem:[#allocation10 + $0x10] sm:$0xff] }
 0x26a   :  { %v2360_v35 = vor.u32 %v2704_v33, %v2357_v34  ;;  %v2272_v33 = vor.u32 %v2683_v29, %v2269_v30  ;;  %v2275_v34 = vld [vmem:[#allocation8 + $0x8] sm:$0xf]  ;;  %v2734_v28 = vld [vmem:[#allocation10 + $0x98] sm:$0xff] }
 0x26b   :  { %861 = vmatmul.bf16.vlgmr.msra.gmra.mxu0 %v706_v36  ;;  %v2331_v36 = vld [vmem:[#allocation8 + $0x80] sm:$0xf]  ;;  %v2716_v29 = vld [vmem:[#allocation10 + $0x8] sm:$0xff] }
 0x26c   :  { %1170 = vmatpush.bf16.msrb.mxu0 %v2360_v35  ;;  %v2686_v35 = vld [vmem:[#allocation8 + $0x14] sm:$0xf0]  ;;  %v2740_v30 = vld [vmem:[#allocation10 + $0xc8] sm:$0xff] }
 0x2e6   :  { %v848_v37 = vpop.f32.mrf.mxu3 }
 0x2e7   :  { %v849_v38 = vadd.f32 %v2792_v47, %v848_v37  ;;  %v2699_v37 = vld [vmem:[#allocation8 + $0x84] sm:$0xf] }
 0x2e8   :  { %v862_v39 = vpop.f32.mrf.mxu0 }
 0x2e9   :  { %v863_v40 = vadd.f32 %v862_v39, %v849_v38  ;;  %v2333_v39 = vld [vmem:[#allocation8 + $0x90] sm:$0xf0] }
 0x2eb   :  { %v867_v41 = vadd.f32 %v863_v40, %v3245_v44  ;;  %v2339_v40 = vld [vmem:[#allocation8 + $0x88] sm:$0xf] }
 0x2ed   :  { %871 = vadd.xlane.f32.xlu2 %v867_v41 }
 0x2ee   :  { %v850_v42 = vpop.f32.mrf.mxu3 }
 0x2ef   :  { %v851_v43 = vadd.f32 %v2792_v47, %v850_v42  ;;  %v2701_v47 = vld [vmem:[#allocation8 + $0x8c] sm:$0xf0]  ;;  %v2336_v42 = vor.u32 %v2699_v37, %v2333_v39  ;;  %v2277_v37 = vld [vmem:[#allocation8 + $0x18] sm:$0xf0] }
 0x2f0   :  { %v864_v46 = vpop.f32.mrf.mxu0  ;;  %v2332_v38 = vor.u32 %v2701_v47, %v2331_v36  ;;  %v2276_v36 = vor.u32 %v2686_v35, %v2275_v34  ;;  %v2684_v47 = vld [vmem:[#allocation8 + $0xc] sm:$0xf]  ;;  %v2739_v34 = vld [vmem:[#allocation10 + $0xc0] sm:$0xff] }
 0x2f1   :  { %v865_v48 = vadd.f32 %v864_v46, %v851_v43  ;;  %v2700_v46 = vld [vmem:[#allocation8 + $0x8c] sm:$0xf]  ;;  %1143 = vmatpush.bf16.msra.mxu2 %v2336_v42  ;;  %v2280_v39 = vor.u32 %v2684_v47, %v2277_v37  ;;  %v2746_v42 = vld [vmem:[#allocation10 + $0xf8] sm:$0xff]  ;;  %v2723_v47 = vld [vmem:[#allocation10 + $0x40] sm:$0xff] }
 0x2f2   :  { %1129 = vmatpush.bf16.msra.mxu1 %v2332_v38  ;;  %v2724_v35 = vld [vmem:[#allocation10 + $0x48] sm:$0xff]  ;;  %v2731_v37 = vld [vmem:[#allocation10 + $0x80] sm:$0xff] }
 0x2f3   :  { %v868_v49 = vadd.f32 %v865_v48, %v3247_v45  ;;  %v2341_v48 = vld [vmem:[#allocation8 + $0x98] sm:$0xf0] }
 0x2f5   :  { %873 = vadd.xlane.f32.xlu1 %v868_v49 }
 0x360   :  { %v872_v44 = vpop.xlane.xlu2 %871 }
 0x361   :  { %v875_v54 = vmul.f32 0.01, %v872_v44  ;;  %v2695_v44 = vld [vmem:[#allocation8 + $0x64] sm:$0xf] }
 0x363   :  { %v877_v56 = vsub.f32 %v867_v41, %v875_v54  ;;  %v2702_v41 = vld [vmem:[#allocation8 + $0x94] sm:$0xf0]  ;;  %v2316_v54 = vor.u32 %v2697_v51, %v2315_v50  ;;  %v2745_v50 = vld [vmem:[#allocation10 + $0xf0] sm:$0xff] }
 0x364   :  { %v2340_v43 = vor.u32 %v2702_v41, %v2339_v40  ;;  %v2722_v41 = vld [vmem:[#allocation10 + $0x38] sm:$0xff] }
 0x365   :  { %v3276_v57 = vmul.f32 %v3273_v55, %v877_v56  ;;  %v2317_v56 = vld [vmem:[#allocation8 + $0x70] sm:$0xf0]  ;;  %1130 = vmatpush.bf16.msra.mxu1 %v2316_v54 }
 0x366   :  { %1157 = vmatpush.bf16.msra.mxu3 %v2340_v43  ;;  %v2729_v54 = vld [vmem:[#allocation10 + $0x70] sm:$0xff] }
 0x367   :  { %v881_v6 = vmul.f32 %v3276_v57, %v3276_v57 }
 0x368   :  { %v874_v45 = vpop.xlane.xlu1 %873 }
 0x369   :  { %v876_v58 = vmul.f32 0.01, %v874_v45  ;;  %883 = vadd.xlane.f32.xlu2 %v881_v6  ;;  %v2323_v6 = vld [vmem:[#allocation8 + $0x68] sm:$0xf]  ;;  %v2698_v45 = vld [vmem:[#allocation8 + $0x74] sm:$0xf0]  ;;  %1131 = vmatpush.bf16.msra.mxu1 %v2300_v3 }
 0x36b   :  { %v878_v59 = vsub.f32 %v868_v49, %v876_v58  ;;  %v2344_v49 = vor.u32 %v2700_v46, %v2341_v48  ;;  %v2320_v58 = vor.u32 %v2695_v44, %v2317_v56  ;;  %v2730_v46 = vld [vmem:[#allocation10 + $0x78] sm:$0xff]  ;;  %v2737_v56 = vld [vmem:[#allocation10 + $0xb0] sm:$0xff] }
 0x36c   :  { %v2738_v48 = vld [vmem:[#allocation10 + $0xb8] sm:$0xff] }
 0x36d   :  { %v3281_v60 = vmul.f32 %v3273_v55, %v878_v59  ;;  %1171 = vmatpush.bf16.msrb.mxu0 %v2344_v49  ;;  %v2324_v59 = vor.u32 %v2698_v45, %v2323_v6  ;;  %1144 = vmatpush.bf16.msra.mxu2 %v2320_v58  ;;  %v2721_v49 = vld [vmem:[#allocation10 + $0x30] sm:$0xff]  ;;  %v2720_v58 = vld [vmem:[#allocation10 + $0x28] sm:$0xff] }
 0x36e   :  { %1132 = vmatpush.bf16.msra.mxu1 %v2284_v16 }
 0x36f   :  { %v882_v19 = vmul.f32 %v3281_v60, %v3281_v60  ;;  %1158 = vmatpush.bf16.msra.mxu3 %v2324_v59  ;;  %v2744_v59 = vld [vmem:[#allocation10 + $0xe8] sm:$0xff] }
 0x371   :  { %885 = vadd.xlane.f32.xlu1 %v882_v19  ;;  %v2696_v19 = vld [vmem:[#allocation8 + $0x6c] sm:$0xf]  ;;  %1145 = vmatpush.bf16.msra.mxu2 %v2304_v8 }
 0x372   :  { %v2328_v62 = vor.u32 %v2696_v19, %v2325_v61  ;;  %1133 = vmatpush.bf16.msra.mxu1 %v2268_v32  ;;  %v2728_v19 = vld [vmem:[#allocation10 + $0x68] sm:$0xff]  ;;  %v2733_v32 = vld [vmem:[#allocation10 + $0x90] sm:$0xff] }
 0x373   :  { %1159 = vmatpush.bf16.msra.mxu3 %v2308_v9  ;;  %v2736_v61 = vld [vmem:[#allocation10 + $0xa8] sm:$0xff] }
 0x374   :  { %1172 = vmatpush.bf16.msrb.mxu0 %v2328_v62 }
 0x375   :  { %1146 = vmatpush.bf16.msra.mxu2 %v2288_v21 }
 0x376   :  { %1454 = vmatpush.bf16.msrb.mxu1 %v2722_v41 }
 0x377   :  { %1160 = vmatpush.bf16.msra.mxu3 %v2292_v22  ;;  %v2718_v22 = vld [vmem:[#allocation10 + $0x18] sm:$0xff] }
 0x378   :  { %1173 = vmatpush.bf16.msrb.mxu0 %v2312_v12  ;;  %v2793_v12 = vld [vmem:[%s3443_s6] ss:$0 sm:$0xff] }
 0x379   :  { %1147 = vmatpush.bf16.msra.mxu2 %v2272_v33  ;;  %v2715_v33 = vld [vmem:[#allocation10] sm:$0xff] }
 0x37a   :  { %1455 = vmatpush.bf16.msrb.mxu1 %v2721_v49 }
 0x37b   :  { %1161 = vmatpush.bf16.msra.mxu3 %v2276_v36  ;;  %v2732_v36 = vld [vmem:[#allocation10 + $0x88] sm:$0xff] }
 0x37c   :  { %1174 = vmatpush.bf16.msrb.mxu0 %v2296_v27  ;;  %v2726_v27 = vld [vmem:[#allocation10 + $0x58] sm:$0xff] }
 0x37d   :  { %1468 = vmatpush.bf16.msrb.mxu2 %v2730_v46 }
 0x37e   :  { %1456 = vmatpush.bf16.msrb.mxu1 %v2720_v58 }
 0x37f   :  { %1482 = vmatpush.bf16.msrb.mxu3 %v2738_v48 }
 0x380   :  { %1175 = vmatpush.bf16.msrb.mxu0 %v2280_v39 }
 0x381   :  { %1469 = vmatpush.bf16.msrb.mxu2 %v2729_v54 }
 0x382   :  { %1457 = vmatpush.bf16.msrb.mxu1 %v2719_v1 }
 0x383   :  { %1483 = vmatpush.bf16.msrb.mxu3 %v2737_v56 }
 0x384   :  { %1496 = vmatpush.bf16.msra.mxu0 %v2746_v42 }
 0x385   :  { %1470 = vmatpush.bf16.msrb.mxu2 %v2728_v19 }
 0x386   :  { %1458 = vmatpush.bf16.msrb.mxu1 %v2718_v22 }
 0x387   :  { %1484 = vmatpush.bf16.msrb.mxu3 %v2736_v61 }
 0x388   :  { %1497 = vmatpush.bf16.msra.mxu0 %v2745_v50 }
 0x38a   :  { %1459 = vmatpush.bf16.msrb.mxu1 %v2717_v25 }
 0x38b   :  { %1485 = vmatpush.bf16.msrb.mxu3 %v2735_v24 }
 0x38c   :  { %1498 = vmatpush.bf16.msra.mxu0 %v2744_v59 }
 0x38e   :  { %1460 = vmatpush.bf16.msrb.mxu1 %v2716_v29 }
 0x38f   :  { %1486 = vmatpush.bf16.msrb.mxu3 %v2734_v28 }
 0x390   :  { %1499 = vmatpush.bf16.msra.mxu0 %v2743_v2 }
 0x392   :  { %1461 = vmatpush.bf16.msrb.mxu1 %v2715_v33 }
 0x393   :  { %1487 = vmatpush.bf16.msrb.mxu3 %v2733_v32 }
 0x394   :  { %1500 = vmatpush.bf16.msra.mxu0 %v2742_v23 }
 0x397   :  { %1488 = vmatpush.bf16.msrb.mxu3 %v2732_v36 }
 0x39b   :  { %1489 = vmatpush.bf16.msrb.mxu3 %v2731_v37 }
 0x3dc   :  { %v884_v26 = vpop.xlane.xlu2 %883 }
 0x3dd   :  { %v887_v31 = vmul.f32 0.01, %v884_v26  ;;  %v2741_v26 = vld [vmem:[#allocation10 + $0xd0] sm:$0xff] }
 0x3de   :  { %1501 = vmatpush.bf16.msra.mxu0 %v2741_v26 }
 0x3df   :  { %v889_v38 = vadd.f32 1e-05, %v887_v31  ;;  %v2725_v31 = vld [vmem:[#allocation10 + $0x50] sm:$0xff] }
 0x3e1   :  { %2817 = vrsqrt.f32 %v889_v38  ;;  %vm897_vm6 = vweird.f32 %v889_v38 }
 0x3e2   :  { %1502 = vmatpush.bf16.msra.mxu0 %v2740_v30 }
 0x3e4   :  { %v886_v40 = vpop.xlane.xlu1 %885 }
 0x3e5   :  { %v888_v43 = vmul.f32 0.01, %v886_v40 }
 0x3e6   :  { %1503 = vmatpush.bf16.msra.mxu0 %v2739_v34 }
 0x3e7   :  { %v2818_v51 = vpop.eup %2817  ;;  %v890_v44 = vadd.f32 1e-05, %v888_v43 }
 0x3e8   :  { %v892_v6 = vmul.f32 %v2818_v51, %v889_v38  ;;  %vm898_vm5 = vweird.f32 %v2818_v51  ;;  %v956_v38 = vld [vmem:[%s3446_s9] sm:$0xf] }
 0x3e9   :  { %2819 = vrsqrt.f32 %v890_v44  ;;  %vm899_vm7 = vmor %vm897_vm6, %vm898_vm5  ;;  %vm907_vm9 = vweird.f32 %v890_v44  ;;  %v958_v41 = vperm.slane %v956_v38, 0  ;;  %v961_v42 = vperm.slane %v956_v38, 3 }
 0x3ea   :  { %v893_v45 = vmul.f32 %v2818_v51, %v892_v6  ;;  %v960_v56 = vperm.slane %v956_v38, 2 }
 0x3ec   :  { %v894_v62 = vmul.f32 0.5, %v893_v45 }
 0x3ee   :  { %v895_v63 = vsub.f32 1.5, %v894_v62 }
 0x3ef   :  { %v2820_v3 = vpop.eup %2819 }
 0x3f0   :  { %v896_v4 = vmul.f32 %v2818_v51, %v895_v63  ;;  %v902_v5 = vmul.f32 %v2820_v3, %v890_v44  ;;  %vm908_vm8 = vweird.f32 %v2820_v3 }
 0x3f1   :  { %vm909_vm10 = vmor %vm907_vm9, %vm908_vm8 }
 0x3f2   :  { %v903_v7 = vmul.f32 %v2820_v3, %v902_v5  ;;  %v900_v8 = vsel %vm899_vm7, %v2818_v51, %v896_v4  ;;  %v959_v51 = vperm.slane %v956_v38, 1 }
 0x3f3   :  { %v911_v11 = vmul.f32 %v900_v8, %v3276_v57 }
 0x3f4   :  { %v904_v9 = vmul.f32 0.5, %v903_v7 }
 0x3f5   :  { %v916_v16 = vmul.f32 %v2793_v12, %v911_v11 }
 0x3f6   :  { %v905_v10 = vsub.f32 1.5, %v904_v9 }
 0x3f7   :  { %v3293_v20 = vadd.f32 %v2794_v17, %v916_v16 }
 0x3f8   :  { %v906_v13 = vmul.f32 %v2820_v3, %v905_v10 }
 0x3fa   :  { %v910_v14 = vsel %vm909_vm10, %v2820_v3, %v906_v13 }
 0x3fb   :  { %v912_v15 = vmul.f32 %v910_v14, %v3281_v60  ;;  %v2727_v60 = vld [vmem:[#allocation10 + $0x60] sm:$0xff] }
 0x3fc   :  { %1471 = vmatpush.bf16.msrb.mxu2 %v2727_v60  ;;  %v2795_v14 = vld [vmem:[%s3448_s11] ss:$0 sm:$0xff] }
 0x3fd   :  { %v917_v18 = vmul.f32 %v2793_v12, %v912_v15 }
 0x3ff   :  { %v3295_v21 = vadd.f32 %v2794_v17, %v917_v18 }
 0x400   :  { %1472 = vmatpush.bf16.msrb.mxu2 %v2726_v27 }
 0x401   :  { %v923_v57 = vpack.c.bf16 %v3295_v21, %v3293_v20 }
 0x403   :  { %1134 = vmatmul.bf16.vlgmr.msra.gmra.mxu1 %v923_v57  ;;  %1148 = vmatmul.bf16.vlgmr.msra.gmra.mxu2 %v923_v57 }
 0x404   :  { %1162 = vmatmul.bf16.vlgmr.msra.gmra.mxu3 %v923_v57  ;;  %1176 = vmatmul.bf16.vlgmr.msrb.gmra.mxu0 %v923_v57 }
 0x405   :  { %1473 = vmatpush.bf16.msrb.mxu2 %v2725_v31 }
 0x409   :  { %1474 = vmatpush.bf16.msrb.mxu2 %v2724_v35 }
 0x40d   :  { %1475 = vmatpush.bf16.msrb.mxu2 %v2723_v47 }
 0x480   :  { %v1135_v39 = vpop.f32.mrf.mxu1 }
 0x481   :  { %v1177_v40 = vpop.f32.mrf.mxu0  ;;  %v1136_v46 = vadd.f32 %v1135_v39, %v958_v41 }
 0x482   :  { %v1178_v49 = vadd.f32 %v1177_v40, %v961_v42  ;;  %v2754_v40 = vld [vmem:[#allocation11 + $0x38] sm:$0xff] }
 0x483   :  { %v1182_v45 = vmax.f32 %v1136_v46, 0.0  ;;  %1635 = vmatpush.bf16.msra.mxu1 %v2754_v40  ;;  %v3322_v46 = vld [vmem:[#allocation13 + $0x30] sm:$0xff] }
 0x484   :  { %v1185_v59 = vmax.f32 %v1178_v49, 0.0  ;;  %v2750_v49 = vld [vmem:[#allocation11 + $0x18] sm:$0xff] }
 0x486   :  { %v1149_v43 = vpop.f32.mrf.mxu2 }
 0x487   :  { %v1163_v48 = vpop.f32.mrf.mxu3  ;;  %v1150_v61 = vadd.f32 %v1149_v43, %v959_v51  ;;  %v2752_v43 = vld [vmem:[#allocation11 + $0x28] sm:$0xff] }
 0x488   :  { %v1137_v50 = vpop.f32.mrf.mxu1  ;;  %v1164_v63 = vadd.f32 %v1163_v48, %v960_v56  ;;  %v3327_v48 = vld [vmem:[#allocation13 + $0x28] sm:$0xff] }
 0x489   :  { %v1138_v44 = vadd.f32 %v1137_v50, %v958_v41  ;;  %v1179_v54 = vpop.f32.mrf.mxu0  ;;  %v1183_v7 = vmax.f32 %v1150_v61, 0.0  ;;  %v2753_v41 = vld [vmem:[#allocation11 + $0x30] sm:$0xff]  ;;  %v3332_v50 = vld [vmem:[#allocation13 + $0x20] sm:$0xff] }
 0x48a   :  { %v1180_v6 = vadd.f32 %v1179_v54, %v961_v42  ;;  %v1184_v9 = vmax.f32 %v1164_v63, 0.0  ;;  %v3317_v42 = vld [vmem:[#allocation13 + $0x38] sm:$0xff]  ;;  %1636 = vmatpush.bf16.msra.mxu1 %v2753_v41  ;;  %v2748_v54 = vld [vmem:[#allocation11 + $0x8] sm:$0xff]  ;;  %v3352_v61 = vld [vmem:[#allocation13] sm:$0xff] }
 0x48b   :  { %v1186_v58 = vmax.f32 %v1138_v44, 0.0  ;;  %1731 = vmatpush.bf16.msra.mxu2 %v3317_v42  ;;  %1753 = vmatpush.bf16.msra.mxu3 %v3317_v42  ;;  %v3337_v44 = vld [vmem:[#allocation13 + $0x18] sm:$0xff] }
 0x48c   :  { %v1189_v19 = vmax.f32 %v1180_v6, 0.0  ;;  %1775 = vmatpush.bf16.msrb.mxu0 %v3317_v42 }
 0x48d   :  { %v1190_v62 = vpack.c.bf16 %v1186_v58, %v1182_v45  ;;  %v2747_v58 = vld [vmem:[#allocation11] sm:$0xff] }
 0x48e   :  { %v1193_v1 = vpack.c.bf16 %v1189_v19, %v1185_v59  ;;  %v1151_v2 = vpop.f32.mrf.mxu2  ;;  %1637 = vmatpush.bf16.msra.mxu1 %v2752_v43  ;;  %v3345_v59 = vld [vmem:[#allocation13 + $0x8] sm:$0xff] }
 0x48f   :  { %v1152_v3 = vadd.f32 %v1151_v2, %v959_v51  ;;  %v1165_v4 = vpop.f32.mrf.mxu3  ;;  %1462 = vmatmul.bf16.vlgmr.msrb.gmra.mxu1 %v1190_v62  ;;  %1732 = vmatpush.bf16.msra.mxu2 %v3322_v46  ;;  %v2749_v51 = vld [vmem:[#allocation11 + $0x10] sm:$0xff] }
 0x490   :  { %v1166_v5 = vadd.f32 %v1165_v4, %v960_v56  ;;  %1504 = vmatmul.bf16.vlgmr.msra.gmra.mxu0 %v1193_v1  ;;  %1754 = vmatpush.bf16.msra.mxu3 %v3322_v46  ;;  %v3342_v56 = vld [vmem:[#allocation13 + $0x10] sm:$0xff] }
 0x491   :  { %v1187_v8 = vmax.f32 %v1152_v3, 0.0  ;;  %1776 = vmatpush.bf16.msrb.mxu0 %v3322_v46 }
 0x492   :  { %v1188_v10 = vmax.f32 %v1166_v5, 0.0 }
 0x493   :  { %v1191_v11 = vpack.c.bf16 %v1187_v8, %v1183_v7  ;;  %1733 = vmatpush.bf16.msra.mxu2 %v3327_v48 }
 0x494   :  { %v1192_v12 = vpack.c.bf16 %v1188_v10, %v1184_v9  ;;  %1755 = vmatpush.bf16.msra.mxu3 %v3327_v48 }
 0x495   :  { %1476 = vmatmul.bf16.vlgmr.msrb.gmra.mxu2 %v1191_v11  ;;  %1777 = vmatpush.bf16.msrb.mxu0 %v3327_v48 }
 0x496   :  { %1490 = vmatmul.bf16.vlgmr.msrb.gmra.mxu3 %v1192_v12 }
 0x497   :  { %1734 = vmatpush.bf16.msra.mxu2 %v3332_v50 }
 0x498   :  { %1756 = vmatpush.bf16.msra.mxu3 %v3332_v50 }
 0x499   :  { %1778 = vmatpush.bf16.msrb.mxu0 %v3332_v50 }
 0x49b   :  { %1735 = vmatpush.bf16.msra.mxu2 %v3337_v44 }
 0x49c   :  { %1757 = vmatpush.bf16.msra.mxu3 %v3337_v44 }
 0x49d   :  { %1779 = vmatpush.bf16.msrb.mxu0 %v3337_v44 }
 0x49f   :  { %1736 = vmatpush.bf16.msra.mxu2 %v3342_v56 }
 0x4a0   :  { %1758 = vmatpush.bf16.msra.mxu3 %v3342_v56 }
 0x4a1   :  { %1780 = vmatpush.bf16.msrb.mxu0 %v3342_v56 }
 0x4a3   :  { %1737 = vmatpush.bf16.msra.mxu2 %v3345_v59 }
 0x4a4   :  { %1759 = vmatpush.bf16.msra.mxu3 %v3345_v59 }
 0x4a5   :  { %1781 = vmatpush.bf16.msrb.mxu0 %v3345_v59 }
 0x4a7   :  { %1738 = vmatpush.bf16.msra.mxu2 %v3352_v61 }
 0x4a8   :  { %1760 = vmatpush.bf16.msra.mxu3 %v3352_v61 }
 0x4a9   :  { %1782 = vmatpush.bf16.msrb.mxu0 %v3352_v61 }
 0x4aa   :  { %1739 = vmatmul.bf16.vlgmr.msra.gmra.mxu2 %v3085_v0 }
 0x4ab   :  { %1819 = vmatpush.bf16.msrb.mxu2 %v3317_v42 }
 0x4ac   :  { %1841 = vmatpush.bf16.msrb.mxu3 %v3317_v42 }
 0x4ad   :  { %1863 = vmatpush.bf16.msra.mxu0 %v3317_v42 }
 0x4af   :  { %1820 = vmatpush.bf16.msrb.mxu2 %v3322_v46 }
 0x4b0   :  { %1842 = vmatpush.bf16.msrb.mxu3 %v3322_v46 }
 0x4b1   :  { %1864 = vmatpush.bf16.msra.mxu0 %v3322_v46 }
 0x4b3   :  { %1821 = vmatpush.bf16.msrb.mxu2 %v3327_v48 }
 0x4b4   :  { %1843 = vmatpush.bf16.msrb.mxu3 %v3327_v48 }
 0x4b5   :  { %1865 = vmatpush.bf16.msra.mxu0 %v3327_v48 }
 0x4b7   :  { %1822 = vmatpush.bf16.msrb.mxu2 %v3332_v50 }
 0x4b8   :  { %1844 = vmatpush.bf16.msrb.mxu3 %v3332_v50 }
 0x4b9   :  { %1866 = vmatpush.bf16.msra.mxu0 %v3332_v50 }
 0x4bb   :  { %1823 = vmatpush.bf16.msrb.mxu2 %v3337_v44 }
 0x4bc   :  { %1845 = vmatpush.bf16.msrb.mxu3 %v3337_v44 }
 0x4bd   :  { %1867 = vmatpush.bf16.msra.mxu0 %v3337_v44 }
 0x4bf   :  { %1824 = vmatpush.bf16.msrb.mxu2 %v3342_v56 }
 0x4c0   :  { %1846 = vmatpush.bf16.msrb.mxu3 %v3342_v56 }
 0x4c1   :  { %1868 = vmatpush.bf16.msra.mxu0 %v3342_v56 }
 0x4c3   :  { %1825 = vmatpush.bf16.msrb.mxu2 %v3345_v59 }
 0x4c4   :  { %1847 = vmatpush.bf16.msrb.mxu3 %v3345_v59 }
 0x4c5   :  { %1869 = vmatpush.bf16.msra.mxu0 %v3345_v59 }
 0x4c7   :  { %1826 = vmatpush.bf16.msrb.mxu2 %v3352_v61 }
 0x4c8   :  { %1848 = vmatpush.bf16.msrb.mxu3 %v3352_v61 }
 0x4c9   :  { %1870 = vmatpush.bf16.msra.mxu0 %v3352_v61 }
 0x50c   :  { %v1463_v13 = vpop.f32.mrf.mxu1 }
 0x50d   :  { %v1464_v15 = vadd.f32 %v2795_v14, %v1463_v13  ;;  %v1505_v57 = vpop.f32.mrf.mxu0 }
 0x514   :  { %v1465_v23 = vpop.f32.mrf.mxu1 }
 0x515   :  { %v1466_v24 = vadd.f32 %v2795_v14, %v1465_v23  ;;  %v1507_v30 = vpop.f32.mrf.mxu0  ;;  %v2796_v14 = vld [vmem:[%s3449_s12] ss:$0 sm:$0xff] }
 0x518   :  { %v1477_v16 = vpop.f32.mrf.mxu2 }
 0x519   :  { %v1478_v17 = vadd.f32 %v1477_v16, %v1464_v15  ;;  %v1491_v18 = vpop.f32.mrf.mxu3 }
 0x51b   :  { %v1492_v22 = vadd.f32 %v1491_v18, %v1478_v17 }
 0x51d   :  { %v1506_v60 = vadd.f32 %v1505_v57, %v1492_v22  ;;  %v2797_v22 = vld [vmem:[%s3450_s13] ss:$0 sm:$0xff] }
 0x51f   :  { %v1510_v25 = vadd.f32 %v1506_v60, %v3293_v20 }
 0x520   :  { %v1479_v26 = vpop.f32.mrf.mxu2 }
 0x521   :  { %v1480_v27 = vadd.f32 %v1479_v26, %v1466_v24  ;;  %1514 = vadd.xlane.f32.xlu2 %v1510_v25  ;;  %v1493_v28 = vpop.f32.mrf.mxu3 }
 0x523   :  { %v1494_v29 = vadd.f32 %v1493_v28, %v1480_v27  ;;  %v2798_v28 = vld [vmem:[%s3452_s15] ss:$0 sm:$0xff] }
 0x525   :  { %v1508_v31 = vadd.f32 %v1507_v30, %v1494_v29 }
 0x527   :  { %v1511_v32 = vadd.f32 %v1508_v31, %v3295_v21 }
 0x529   :  { %1516 = vadd.xlane.f32.xlu1 %v1511_v32 }
 0x52d   :  { %v1740_v26 = vpop.f32.mrf.mxu2 }
 0x535   :  { %v1742_v27 = vpop.f32.mrf.mxu2 }
 0x594   :  { %v1515_v33 = vpop.xlane.xlu2 %1514 }
 0x595   :  { %v1518_v34 = vmul.f32 0.01, %v1515_v33 }
 0x597   :  { %v1520_v35 = vsub.f32 %v1510_v25, %v1518_v34 }
 0x599   :  { %v3308_v36 = vmul.f32 %v3273_v55, %v1520_v35 }
 0x59b   :  { %v1524_v47 = vmul.f32 %v3308_v36, %v3308_v36 }
 0x59c   :  { %v1517_v20 = vpop.xlane.xlu1 %1516 }
 0x59d   :  { %v1519_v37 = vmul.f32 0.01, %v1517_v20  ;;  %1526 = vadd.xlane.f32.xlu2 %v1524_v47 }
 0x59f   :  { %v1521_v38 = vsub.f32 %v1511_v32, %v1519_v37 }
 0x5a1   :  { %v3313_v39 = vmul.f32 %v3273_v55, %v1521_v38  ;;  %v2751_v55 = vld [vmem:[#allocation11 + $0x20] sm:$0xff] }
 0x5a2   :  { %1638 = vmatpush.bf16.msra.mxu1 %v2751_v55 }
 0x5a3   :  { %v1525_v21 = vmul.f32 %v3313_v39, %v3313_v39 }
 0x5a5   :  { %1528 = vadd.xlane.f32.xlu1 %v1525_v21 }
 0x5a6   :  { %1639 = vmatpush.bf16.msra.mxu1 %v2750_v49 }
 0x5aa   :  { %1640 = vmatpush.bf16.msra.mxu1 %v2749_v51 }
 0x5ae   :  { %1641 = vmatpush.bf16.msra.mxu1 %v2748_v54 }
 0x5b2   :  { %1642 = vmatpush.bf16.msra.mxu1 %v2747_v58  ;;  %v2799_v58 = vld [vmem:[%s3454_s17] ss:$0 sm:$0xff] }
 0x5b6   :  { %1797 = vmatpush.bf16.msrb.mxu1 %v3317_v42 }
 0x5ba   :  { %1798 = vmatpush.bf16.msrb.mxu1 %v3322_v46 }
 0x5be   :  { %1799 = vmatpush.bf16.msrb.mxu1 %v3327_v48 }
 0x5c2   :  { %1800 = vmatpush.bf16.msrb.mxu1 %v3332_v50 }
 0x5c6   :  { %1801 = vmatpush.bf16.msrb.mxu1 %v3337_v44 }
 0x5ca   :  { %1802 = vmatpush.bf16.msrb.mxu1 %v3342_v56 }
 0x5ce   :  { %1803 = vmatpush.bf16.msrb.mxu1 %v3345_v59 }
 0x5d2   :  { %1804 = vmatpush.bf16.msrb.mxu1 %v3352_v61 }
 0x610   :  { %v1527_v6 = vpop.xlane.xlu2 %1526 }
 0x611   :  { %v1530_v45 = vmul.f32 0.01, %v1527_v6 }
 0x613   :  { %v1532_v19 = vadd.f32 1e-05, %v1530_v45 }
 0x615   :  { %2821 = vrsqrt.f32 %v1532_v19  ;;  %vm1540_vm12 = vweird.f32 %v1532_v19 }
 0x618   :  { %v1529_v62 = vpop.xlane.xlu1 %1528 }
 0x619   :  { %v1531_v63 = vmul.f32 0.01, %v1529_v62 }
 0x61b   :  { %v2822_v1 = vpop.eup %2821  ;;  %v1533_v2 = vadd.f32 1e-05, %v1531_v63 }
 0x61c   :  { %v1535_v3 = vmul.f32 %v2822_v1, %v1532_v19  ;;  %vm1541_vm11 = vweird.f32 %v2822_v1 }
 0x61d   :  { %2823 = vrsqrt.f32 %v1533_v2  ;;  %vm1542_vm13 = vmor %vm1540_vm12, %vm1541_vm11  ;;  %vm1550_vm15 = vweird.f32 %v1533_v2 }
 0x61e   :  { %v1536_v4 = vmul.f32 %v2822_v1, %v1535_v3 }
 0x620   :  { %v1537_v5 = vmul.f32 0.5, %v1536_v4 }
 0x622   :  { %v1538_v7 = vsub.f32 1.5, %v1537_v5 }
 0x623   :  { %v2824_v8 = vpop.eup %2823 }
 0x624   :  { %v1539_v0 = vmul.f32 %v2822_v1, %v1538_v7  ;;  %v1545_v9 = vmul.f32 %v2824_v8, %v1533_v2  ;;  %vm1551_vm14 = vweird.f32 %v2824_v8 }
 0x625   :  { %vm1552_vm0 = vmor %vm1550_vm15, %vm1551_vm14 }
 0x626   :  { %v1546_v10 = vmul.f32 %v2824_v8, %v1545_v9  ;;  %v1543_v11 = vsel %vm1542_vm13, %v2822_v1, %v1539_v0 }
 0x627   :  { %v1554_v15 = vmul.f32 %v1543_v11, %v3308_v36 }
 0x628   :  { %v1547_v12 = vmul.f32 0.5, %v1546_v10 }
 0x629   :  { %v1559_v18 = vmul.f32 %v2796_v14, %v1554_v15 }
 0x62a   :  { %v1548_v13 = vsub.f32 1.5, %v1547_v12 }
 0x62b   :  { %v1564_v60 = vadd.f32 %v2797_v22, %v1559_v18 }
 0x62c   :  { %v1549_v16 = vmul.f32 %v2824_v8, %v1548_v13 }
 0x62e   :  { %v1553_v17 = vsel %vm1552_vm0, %v2824_v8, %v1549_v16 }
 0x62f   :  { %v1555_v57 = vmul.f32 %v1553_v17, %v3313_v39 }
 0x631   :  { %v1560_v23 = vmul.f32 %v2796_v14, %v1555_v57 }
 0x633   :  { %v1565_v24 = vadd.f32 %v2797_v22, %v1560_v23 }
 0x635   :  { %v1566_v25 = vpack.c.bf16 %v1565_v24, %v1564_v60 }
 0x637   :  { %1643 = vmatmul.bf16.vlgmr.msra.gmra.mxu1 %v1566_v25 }
 0x638   :  { %1885 = vmatpush.bf16.msra.mxu1 %v3317_v42 }
 0x63c   :  { %1886 = vmatpush.bf16.msra.mxu1 %v3322_v46 }
 0x640   :  { %1887 = vmatpush.bf16.msra.mxu1 %v3327_v48 }
 0x644   :  { %1888 = vmatpush.bf16.msra.mxu1 %v3332_v50 }
 0x648   :  { %1889 = vmatpush.bf16.msra.mxu1 %v3337_v44 }
 0x64c   :  { %1890 = vmatpush.bf16.msra.mxu1 %v3342_v56 }
 0x650   :  { %1891 = vmatpush.bf16.msra.mxu1 %v3345_v59 }
 0x654   :  { %1892 = vmatpush.bf16.msra.mxu1 %v3352_v61 }
 0x6b4   :  { %v1644_v29 = vpop.f32.mrf.mxu1 }
 0x6b5   :  { %v1645_v30 = vadd.f32 %v2798_v28, %v1644_v29 }
 0x6b7   :  { %v1746_v31 = vperm.slane %v1645_v30, 1  ;;  %v1768_v32 = vperm.slane %v1645_v30, 2  ;;  %v1790_v33 = vperm.slane %v1645_v30, 3  ;;  %v1812_v34 = vperm.slane %v1645_v30, 4 }
 0x6b8   :  { %v1834_v35 = vperm.slane %v1645_v30, 5  ;;  %v1856_v36 = vperm.slane %v1645_v30, 6  ;;  %v1878_v47 = vperm.slane %v1645_v30, 7  ;;  %v1674_v20 = vperm.slane %v1645_v30, 0 }
 0x6b9   :  { %v1747_v37 = vmul.f32 %v3268_v52, %v1746_v31  ;;  %v1769_v38 = vmul.f32 %v3268_v52, %v1768_v32  ;;  %v1791_v39 = vmul.f32 %v3268_v52, %v1790_v33  ;;  %v1813_v21 = vmul.f32 %v3268_v52, %v1812_v34 }
 0x6ba   :  { %v1835_v40 = vmul.f32 %v3268_v52, %v1834_v35  ;;  %v1857_v41 = vmul.f32 %v3268_v52, %v1856_v36  ;;  %v1879_v42 = vmul.f32 %v3268_v52, %v1878_v47  ;;  %v1675_v55 = vmul.f32 %v3268_v52, %v1674_v20 }
 0x6bc   :  { %v1646_v43 = vpop.f32.mrf.mxu1 }
 0x6bd   :  { %v1647_v46 = vadd.f32 %v2798_v28, %v1646_v43  ;;  %v2770_v43 = vld [vmem:[#allocation14 + $0x38] sm:$0xff] }
 0x6be   :  { %1969 = vmatpush.bf16.msra.mxu2 %v2770_v43 }
 0x6bf   :  { %v1676_v48 = vperm.slane %v1647_v46, 0  ;;  %v1748_v49 = vperm.slane %v1647_v46, 1  ;;  %v1770_v50 = vperm.slane %v1647_v46, 2  ;;  %v1792_v51 = vperm.slane %v1647_v46, 3 }
 0x6c0   :  { %v1814_v44 = vperm.slane %v1647_v46, 4  ;;  %v1836_v54 = vperm.slane %v1647_v46, 5  ;;  %v1858_v56 = vperm.slane %v1647_v46, 6  ;;  %v1880_v6 = vperm.slane %v1647_v46, 7  ;;  %v2769_v46 = vld [vmem:[#allocation14 + $0x30] sm:$0xff] }
 0x6c1   :  { %v1677_v45 = vmul.f32 %v3270_v53, %v1676_v48  ;;  %v1749_v59 = vmul.f32 %v3270_v53, %v1748_v49  ;;  %v1771_v19 = vmul.f32 %v3270_v53, %v1770_v50  ;;  %v1793_v52 = vmul.f32 %v3270_v53, %v1792_v51  ;;  %v2767_v48 = vld [vmem:[#allocation14 + $0x20] sm:$0xff]  ;;  %v2766_v49 = vld [vmem:[#allocation14 + $0x18] sm:$0xff] }
 0x6c2   :  { %v1815_v61 = vmul.f32 %v3270_v53, %v1814_v44  ;;  %v1837_v62 = vmul.f32 %v3270_v53, %v1836_v54  ;;  %v1859_v63 = vmul.f32 %v3270_v53, %v1858_v56  ;;  %v1881_v1 = vmul.f32 %v3270_v53, %v1880_v6  ;;  %1970 = vmatpush.bf16.msra.mxu2 %v2769_v46  ;;  %v2765_v6 = vld [vmem:[#allocation14 + $0x10] sm:$0xff] }
 0x6c3   :  { %v1678_v2 = vadd.f32 %v1677_v45, %v1675_v55  ;;  %v1750_v3 = vadd.f32 %v1749_v59, %v1747_v37  ;;  %v1772_v4 = vadd.f32 %v1771_v19, %v1769_v38  ;;  %v1794_v5 = vadd.f32 %v1793_v52, %v1791_v39  ;;  %v2768_v55 = vld [vmem:[#allocation14 + $0x28] sm:$0xff] }
 0x6c4   :  { %v1816_v7 = vadd.f32 %v1815_v61, %v1813_v21  ;;  %v1838_v8 = vadd.f32 %v1837_v62, %v1835_v40  ;;  %v1860_v0 = vadd.f32 %v1859_v63, %v1857_v41  ;;  %v1882_v9 = vadd.f32 %v1881_v1, %v1879_v42  ;;  %v2764_v45 = vld [vmem:[#allocation14 + $0x8] sm:$0xff]  ;;  %v2800_v63 = vld [vmem:[%s3471_s29] ss:$0 sm:$0xff] }
 0x6c5   :  { %v1682_v10 = vadd.f32 %v2799_v58, %v1678_v2  ;;  %v1751_v11 = vadd.f32 %v2799_v58, %v1750_v3  ;;  %v1773_v12 = vadd.f32 %v2799_v58, %v1772_v4  ;;  %v1795_v13 = vadd.f32 %v2799_v58, %v1794_v5 }
 0x6c6   :  { %v1817_v14 = vadd.f32 %v2799_v58, %v1816_v7  ;;  %v1839_v15 = vadd.f32 %v2799_v58, %v1838_v8  ;;  %v1861_v16 = vadd.f32 %v2799_v58, %v1860_v0  ;;  %v3428_v17 = vadd.f32 %v2799_v58, %v1882_v9  ;;  %1971 = vmatpush.bf16.msra.mxu2 %v2768_v55  ;;  %v2763_v58 = vld [vmem:[#allocation14] sm:$0xff] }
 0x6c7   :  { %v1744_v18 = vadd.f32 %v1740_v26, %v1682_v10 }
 0x6c9   :  { %2825 = vtanh.f32 %v1744_v18 }
 0x6ca   :  { %1972 = vmatpush.bf16.msra.mxu2 %v2767_v48 }
 0x6ce   :  { %1973 = vmatpush.bf16.msra.mxu2 %v2766_v49 }
 0x6cf   :  { %v2826_v53 = vpop.eup %2825 }
 0x6d0   :  { %v1752_v57 = vpack.c.bf16 %v2826_v53, %v2826_v53 }
 0x6d2   :  { %1761 = vmatmul.bf16.vlgmr.msra.gmra.mxu3 %v1752_v57  ;;  %1974 = vmatpush.bf16.msra.mxu2 %v2765_v6 }
 0x6d6   :  { %1975 = vmatpush.bf16.msra.mxu2 %v2764_v45 }
 0x6da   :  { %1976 = vmatpush.bf16.msra.mxu2 %v2763_v58 }
 0x755   :  { %v1762_v22 = vpop.f32.mrf.mxu3 }
 0x756   :  { %v1766_v23 = vadd.f32 %v1762_v22, %v1751_v11 }
 0x758   :  { %2827 = vtanh.f32 %v1766_v23 }
 0x75d   :  { %v1764_v60 = vpop.f32.mrf.mxu3 }
 0x75e   :  { %v2828_v24 = vpop.eup %2827 }
 0x75f   :  { %v1774_v25 = vpack.c.bf16 %v2828_v24, %v2828_v24 }
 0x761   :  { %1783 = vmatmul.bf16.vlgmr.msrb.gmra.mxu0 %v1774_v25 }
 0x7de   :  { %v1784_v27 = vpop.f32.mrf.mxu0 }
 0x7df   :  { %v1788_v28 = vadd.f32 %v1784_v27, %v1773_v12 }
 0x7e1   :  { %2829 = vtanh.f32 %v1788_v28 }
 0x7e6   :  { %v1786_v29 = vpop.f32.mrf.mxu0 }
 0x7e7   :  { %v2830_v30 = vpop.eup %2829 }
 0x7e8   :  { %v1796_v31 = vpack.c.bf16 %v2830_v30, %v2830_v30 }
 0x7ea   :  { %1805 = vmatmul.bf16.vlgmr.msrb.gmra.mxu1 %v1796_v31 }
 0x867   :  { %v1806_v32 = vpop.f32.mrf.mxu1 }
 0x868   :  { %v1810_v26 = vadd.f32 %v1806_v32, %v1795_v13 }
 0x86a   :  { %2831 = vtanh.f32 %v1810_v26 }
 0x86f   :  { %v1808_v33 = vpop.f32.mrf.mxu1 }
 0x870   :  { %v2832_v34 = vpop.eup %2831 }
 0x871   :  { %v1818_v35 = vpack.c.bf16 %v2832_v34, %v2832_v34 }
 0x873   :  { %1827 = vmatmul.bf16.vlgmr.msrb.gmra.mxu2 %v1818_v35 }
 0x8f6   :  { %v1828_v36 = vpop.f32.mrf.mxu2 }
 0x8f7   :  { %v1832_v47 = vadd.f32 %v1828_v36, %v1817_v14 }
 0x8f9   :  { %2833 = vtanh.f32 %v1832_v47 }
 0x8fe   :  { %v1830_v20 = vpop.f32.mrf.mxu2 }
 0x8ff   :  { %v2834_v37 = vpop.eup %2833 }
 0x900   :  { %v1840_v38 = vpack.c.bf16 %v2834_v37, %v2834_v37 }
 0x902   :  { %1849 = vmatmul.bf16.vlgmr.msrb.gmra.mxu3 %v1840_v38 }
 0x985   :  { %v1850_v39 = vpop.f32.mrf.mxu3 }
 0x986   :  { %v1854_v21 = vadd.f32 %v1850_v39, %v1839_v15 }
 0x988   :  { %2835 = vtanh.f32 %v1854_v21 }
 0x98d   :  { %v1852_v40 = vpop.f32.mrf.mxu3 }
 0x98e   :  { %v2836_v41 = vpop.eup %2835 }
 0x98f   :  { %v1862_v42 = vpack.c.bf16 %v2836_v41, %v2836_v41 }
 0x991   :  { %1871 = vmatmul.bf16.vlgmr.msra.gmra.mxu0 %v1862_v42 }
 0xa0e   :  { %v1872_v50 = vpop.f32.mrf.mxu0 }
 0xa0f   :  { %v1876_v51 = vadd.f32 %v1872_v50, %v1861_v16 }
 0xa11   :  { %2837 = vtanh.f32 %v1876_v51 }
 0xa16   :  { %v1874_v44 = vpop.f32.mrf.mxu0 }
 0xa17   :  { %v2838_v54 = vpop.eup %2837 }
 0xa18   :  { %v1884_v56 = vpack.c.bf16 %v2838_v54, %v2838_v54 }
 0xa1a   :  { %1893 = vmatmul.bf16.vlgmr.msra.gmra.mxu1 %v1884_v56 }
 0xa97   :  { %v1894_v59 = vpop.f32.mrf.mxu1 }
 0xa98   :  { %v1898_v19 = vadd.f32 %v1894_v59, %v3428_v17 }
 0xa9a   :  { %2839 = vtanh.f32 %v1898_v19 }
 0xa9f   :  { %v1896_v52 = vpop.f32.mrf.mxu1 }
 0xaa0   :  { %v2840_v61 = vpop.eup %2839 }
 0xaa1   :  { %v1900_v62 = vpack.c.bf16 %v2840_v61, %v2840_v61 }
 0xaa3   :  { %1977 = vmatmul.bf16.vlgmr.msra.gmra.mxu2 %v1900_v62 }
 0xb26   :  { %v1978_v1 = vpop.f32.mrf.mxu2 }
 0xb27   :  { %v1979_v2 = vadd.f32 %v2800_v63, %v1978_v1 }
 0xb29   :  { %1982 = vst [vmem:[#allocation16] sm:$0x3] %v1979_v2 }
 0xb2a   :  { %1993 = dma.vmem_to_hbm [thread:$0]  %s1989_s16, 32, %s1991_s24, [#allocation4]  }
 0xb2e   :  { %v1980_v3 = vpop.f32.mrf.mxu2 }
 0xb2f   :  { %3067 = dma.done.wait [#allocation4], 32  }
 0xb30   :  { %3068 = vsyncadd [#allocation4], 4294967264 }
 0xb31   :  { %1998 = vsyncpa [#allocation3], 1 }
 0xb32   :  { %1999 = vsyncpa [#allocation6], 1 }
 0xb33   :  { %2000 = vsyncpa [#allocation9], 1 }
 0xb34   :  { %2001 = vsyncpa [#allocation12], 1 }
 0xb35   :  { %2002 = vsyncpa [#allocation15], 1 }
 0xb36   :  { %2003 = vsyncpa [#allocation4], 1 }

</bundles_post_ra>
